<compile_context>
chip_gen: v7x
topology: tpu7x:2x2x1
jax: 0.10.0
libtpu: 0.0.40
codegen_flags: <defaults>
</compile_context>

<pallas_src>
import functools

import jax
import jax.numpy as jnp
from jax.experimental import pallas as pl
from jax.experimental.pallas import tpu as pltpu


def _round_up(x, m):
    return (x + m - 1) // m * m


# ------------------------------- fused kernel -------------------------------------- #

def _encode_image_kernel(
    # varies with the batch-block grid axis
    patches_ref,                       # (M, C*P*P)  prepadded (cls/pad rows are zero)
    # grid-invariant
    base_ref,                          # (n_pad, W)  cls+pos template (zero pad rows)
    mask_ref,                          # (M, M)      additive block-diag + key-pad mask
    ln_pre_g_ref, ln_pre_b_ref,        # (1, W)
    conv1_w_ref,                       # (C*P*P, W)  bf16
    ln_post_g_ref, ln_post_b_ref,      # (1, W)
    proj_ref,                          # (W, out)    bf16
    # streamed per layer (leading `layers` dim squeezed by the BlockSpec)
    ln1_g_ref, ln1_b_ref,              # (1, W)
    w_q_ref, w_k_ref, w_v_ref,         # (W, W)      bf16
    b_q_ref, b_k_ref, b_v_ref,         # (1, W)
    w_out_ref, b_out_ref,              # (W, W) bf16 / (1, W)
    ln2_g_ref, ln2_b_ref,              # (1, W)
    w_fc_ref, b_fc_ref,                # (W, 4W) bf16 / (1, 4W)
    w_proj_ref, b_proj_ref,            # (4W, W) bf16 / (1, W)
    # output
    out_ref,                           # (M, out)
    # scratch
    x_ref,                             # (M, W) f32, persists across the layer axis
    *, heads, b_blk, eps,
):
    layer = pl.program_id(1)
    width = base_ref.shape[-1]
    dh = width // heads
    scale = dh ** -0.5

    def ln(x, g_ref, b_ref):
        # fp32 elementwise (v5e-friendly)
        mu = jnp.mean(x, axis=-1, keepdims=True)
        var = jnp.mean(jnp.square(x - mu), axis=-1, keepdims=True)
        return (x - mu) * jax.lax.rsqrt(var + eps) * g_ref[...] + b_ref[...]

    def mm(x, w_bf16):
        # bf16 MXU operands, fp32 accumulation
        return jnp.dot(x.astype(jnp.bfloat16), w_bf16,
                       preferred_element_type=jnp.float32)

    # --- first layer step: patch embed + cls/pos + ln_pre into persistent scratch ----
    @pl.when(layer == 0)
    def _init():
        # conv1-as-matmul on the prepadded patch rows: class-token and padded rows of
        # `patches` are zero, so (bias-free) they embed to zero and one dense add
        # against the prepadded cls+pos template builds x — no concat, no partial store.
        pe = mm(patches_ref[...], conv1_w_ref[...])                    # (M, W)
        x0 = jnp.tile(base_ref[...], (b_blk, 1)) + pe                  # (M, W)
        x_ref[...] = ln(x0, ln_pre_g_ref, ln_pre_b_ref)                # ln_pre

    # --- one residual attention block per grid step along the layer axis -------------
    x = x_ref[...]                                                     # (M, W) fp32

    # multi-head self-attention sublayer
    h = ln(x, ln1_g_ref, ln1_b_ref)
    q = (mm(h, w_q_ref[...]) + b_q_ref[...]) * scale                   # scale folded once
    k = mm(h, w_k_ref[...]) + b_k_ref[...]
    v = mm(h, w_v_ref[...]) + b_v_ref[...]

    amask = mask_ref[...]                                              # (M, M) additive
    head_outs = []
    for hh in range(heads):
        sl = slice(hh * dh, (hh + 1) * dh)
        qh = q[:, sl].astype(jnp.bfloat16)
        kh = k[:, sl].astype(jnp.bfloat16)
        vh = v[:, sl].astype(jnp.bfloat16)
        # full batch-block scores (M, M); block-diagonal mask keeps attention per-image
        s = jax.lax.dot_general(qh, kh, (((1,), (1,)), ((), ())),
                                preferred_element_type=jnp.float32) + amask
        s = s - jnp.max(s, axis=-1, keepdims=True)
        p = jnp.exp(s)
        p = p * pl.reciprocal(jnp.sum(p, axis=-1, keepdims=True), approx=True)
        head_outs.append(jnp.dot(p.astype(jnp.bfloat16), vh,
                                 preferred_element_type=jnp.float32))  # (M, dh)
    a = jnp.concatenate(head_outs, axis=-1)                            # (M, W) head merge
    x = x + (mm(a, w_out_ref[...]) + b_out_ref[...])                   # residual

    # MLP sublayer: c_fc -> QuickGELU -> c_proj
    h = ln(x, ln2_g_ref, ln2_b_ref)
    hid = mm(h, w_fc_ref[...]) + b_fc_ref[...]                         # (M, 4W)
    hid = hid * jax.nn.sigmoid(1.702 * hid)                            # QuickGELU (fp32)
    x = x + (mm(hid, w_proj_ref[...]) + b_proj_ref[...])               # residual

    x_ref[...] = x                                                     # carry to next layer

    # --- last layer step: ln_post + projection, dense (M, out_dim) store -------------
    @pl.when(layer == pl.num_programs(1) - 1)
    def _final():
        y = ln(x, ln_post_g_ref, ln_post_b_ref)
        out_ref[...] = mm(y, proj_ref[...])                            # class rows picked host-side


# ------------------------------- encode_image wrapper ------------------------------ #

def clip_encode_image(image, p, *, patch, heads, block_images=16):
    B, C, H, W_img = image.shape
    G = H // patch
    G2 = G * G
    cpp = C * patch * patch
    width = p["cls"].shape[-1]
    out_dim = p["proj"].shape[-1]
    layers = p["w_q"].shape[0]
    n_valid = G2 + 1
    n_pad = _round_up(n_valid, 8)

    # images per grid step (block_images should be a multiple of 8 when B > block_images)
    b_blk = B if B <= block_images else block_images
    nb = -(-B // b_blk)
    B_pad = nb * b_blk
    m_rows = b_blk * n_pad

    # Patchify NCHW -> (B, G*G, C*P*P); flatten order (C, P, P) matches the Conv2d
    # weight flatten order, so patches @ conv1_w == stride-P Conv2d of CLIP's ViT stem.
    patches = image.reshape(B, C, G, patch, G, patch)
    patches = patches.transpose(0, 2, 4, 1, 3, 5).reshape(B, G2, cpp)
    # Prepad: row 0 (class token) and sequence-pad rows are zero; batch padded to B_pad.
    patches_padded = jnp.zeros((B_pad, n_pad, cpp), jnp.float32)
    patches_padded = patches_padded.at[:B, 1:n_valid, :].set(patches)
    patches_padded = patches_padded.reshape(B_pad * n_pad, cpp)

    # cls + positional-embedding template; padded sequence rows stay zero.
    base = jnp.zeros((n_pad, width), jnp.float32)
    base = base.at[0].set(p["cls"][0] + p["pos"][0])
    base = base.at[1:n_valid].set(p["pos"][1:n_valid])

    # Additive attention mask (hoisted out of the kernel): block-diagonal over the
    # images stacked in one batch block, padded key rows masked out.  Scores stay fp32
    # so -1e9 is safely finite.
    img_id = jnp.arange(m_rows, dtype=jnp.int32) // n_pad
    pos_id = jnp.arange(m_rows, dtype=jnp.int32) % n_pad
    allowed = (img_id[:, None] == img_id[None, :]) & (pos_id[None, :] < n_valid)
    attn_mask = jnp.where(allowed, 0.0, -1e9).astype(jnp.float32)

    inputs = [
        patches_padded,
        base, attn_mask,
        p["ln_pre_g"], p["ln_pre_b"],
        p["conv1_w"],
        p["ln_post_g"], p["ln_post_b"],
        p["proj"],
        p["ln1_g"], p["ln1_b"],
        p["w_q"], p["w_k"], p["w_v"],
        p["b_q"], p["b_k"], p["b_v"],
        p["w_out"], p["b_out"],
        p["ln2_g"], p["ln2_b"],
        p["w_fc"], p["b_fc"],
        p["w_proj"], p["b_proj"],
    ]

    def const_spec(a):
        zeros = (0,) * a.ndim
        return pl.BlockSpec(a.shape, lambda b, l: zeros)      # whole array, index-invariant

    def layer_spec(a):
        trailing = (0,) * (a.ndim - 1)
        # stream one layer's slice per grid step; leading layer dim squeezed away
        return pl.BlockSpec((None,) + a.shape[1:], lambda b, l: (l,) + trailing)

    in_specs = [pl.BlockSpec((m_rows, cpp), lambda b, l: (b, 0))]
    in_specs += [const_spec(a) for a in inputs[1:9]]
    in_specs += [layer_spec(a) for a in inputs[9:]]

    kernel = functools.partial(
        _encode_image_kernel, heads=heads, b_blk=b_blk, eps=1e-5)

    out = pl.pallas_call(
        kernel,
        out_shape=jax.ShapeDtypeStruct((B_pad * n_pad, out_dim), jnp.float32),
        grid=(nb, layers),
        in_specs=in_specs,
        out_specs=pl.BlockSpec((m_rows, out_dim), lambda b, l: (b, 0)),
        scratch_shapes=[pltpu.VMEM((m_rows, width), jnp.float32)],
        compiler_params=pltpu.CompilerParams(
            # batch blocks across TensorCores; layer axis is a sequential carry
            dimension_semantics=("parallel", "arbitrary"),
        ),
    )(*inputs)

    # pick the class-token row of every real image (free XLA slice)
    return out.reshape(B_pad, n_pad, out_dim)[:B, 0, :]


# ------------------------------- parameters ---------------------------------------- #

def init_params(key, *, in_ch, patch, width, layers, heads, output_dim, num_patches):
    ks = jax.random.split(key, 4 + layers)

    def nrm(k, shape, std=0.02):
        return jax.random.normal(k, shape, jnp.float32) * std

    block_keys = [jax.random.split(ks[4 + i], 6) for i in range(layers)]

    def stack(j, shape):
        return jnp.stack([nrm(block_keys[i][j], shape) for i in range(layers)], axis=0)

    p = {
        # matmul weights stored bf16 (MXU operands); biases / LN params fp32
        "conv1_w": nrm(ks[0], (in_ch * patch * patch, width)).astype(jnp.bfloat16),
        "cls": nrm(ks[1], (1, width)),
        "pos": nrm(ks[2], (num_patches + 1, width)),
        "ln_pre_g": jnp.ones((1, width), jnp.float32),
        "ln_pre_b": jnp.zeros((1, width), jnp.float32),
        "ln_post_g": jnp.ones((1, width), jnp.float32),
        "ln_post_b": jnp.zeros((1, width), jnp.float32),
        "proj": nrm(ks[3], (width, output_dim)).astype(jnp.bfloat16),
        # per-layer params stacked on a leading `layers` axis (streamed per grid step);
        # QKV is pre-split so the kernel never slices a fused 3W-wide result.
        "ln1_g": jnp.ones((layers, 1, width), jnp.float32),
        "ln1_b": jnp.zeros((layers, 1, width), jnp.float32),
        "ln2_g": jnp.ones((layers, 1, width), jnp.float32),
        "ln2_b": jnp.zeros((layers, 1, width), jnp.float32),
        "w_q": stack(0, (width, width)).astype(jnp.bfloat16),
        "w_k": stack(1, (width, width)).astype(jnp.bfloat16),
        "w_v": stack(2, (width, width)).astype(jnp.bfloat16),
        "b_q": jnp.zeros((layers, 1, width), jnp.float32),
        "b_k": jnp.zeros((layers, 1, width), jnp.float32),
        "b_v": jnp.zeros((layers, 1, width), jnp.float32),
        "w_out": stack(3, (width, width)).astype(jnp.bfloat16),
        "b_out": jnp.zeros((layers, 1, width), jnp.float32),
        "w_fc": stack(4, (width, 4 * width)).astype(jnp.bfloat16),
        "b_fc": jnp.zeros((layers, 1, 4 * width), jnp.float32),
        "w_proj": stack(5, (4 * width, width)).astype(jnp.bfloat16),
        "b_proj": jnp.zeros((layers, 1, width), jnp.float32),
    }
    return p


# ---------------------------------- main -------------------------------------------- #

if __name__ == "__main__":
    B, C, H, W = 2, 3, 16, 16
    patch, width, layers, heads, output_dim = 8, 32, 2, 4, 16
    G = H // patch

    key = jax.random.PRNGKey(0)
    k_img, k_par = jax.random.split(key)
    image = jax.random.normal(k_img, (B, C, H, W), jnp.float32)   # NCHW, like PyTorch
    params = init_params(
        k_par, in_ch=C, patch=patch, width=width, layers=layers,
        heads=heads, output_dim=output_dim, num_patches=G * G,
    )

    fwd = jax.jit(functools.partial(clip_encode_image, patch=patch, heads=heads))
    out = fwd(image, params)
    out = jax.block_until_ready(out)
    assert out.shape == (B, output_dim) and out.dtype == jnp.float32
    print("KERNEL_OK")
</pallas_src>

<mosaic_0001>
module attributes {stable_mosaic.version = 11 : i64} {
  func.func @_encode_image_kernel(%arg0: i32, %arg1: i32, %arg2: memref<16x192xf32, #tpu.memory_space<vmem>>, %arg3: memref<8x32xf32, #tpu.memory_space<vmem>>, %arg4: memref<16x16xf32, #tpu.memory_space<vmem>>, %arg5: memref<1x32xf32, #tpu.memory_space<vmem>>, %arg6: memref<1x32xf32, #tpu.memory_space<vmem>>, %arg7: memref<192x32xbf16, #tpu.memory_space<vmem>>, %arg8: memref<1x32xf32, #tpu.memory_space<vmem>>, %arg9: memref<1x32xf32, #tpu.memory_space<vmem>>, %arg10: memref<32x16xbf16, #tpu.memory_space<vmem>>, %arg11: memref<1x1x32xf32, #tpu.memory_space<vmem>>, %arg12: memref<1x1x32xf32, #tpu.memory_space<vmem>>, %arg13: memref<1x32x32xbf16, #tpu.memory_space<vmem>>, %arg14: memref<1x32x32xbf16, #tpu.memory_space<vmem>>, %arg15: memref<1x32x32xbf16, #tpu.memory_space<vmem>>, %arg16: memref<1x1x32xf32, #tpu.memory_space<vmem>>, %arg17: memref<1x1x32xf32, #tpu.memory_space<vmem>>, %arg18: memref<1x1x32xf32, #tpu.memory_space<vmem>>, %arg19: memref<1x32x32xbf16, #tpu.memory_space<vmem>>, %arg20: memref<1x1x32xf32, #tpu.memory_space<vmem>>, %arg21: memref<1x1x32xf32, #tpu.memory_space<vmem>>, %arg22: memref<1x1x32xf32, #tpu.memory_space<vmem>>, %arg23: memref<1x32x128xbf16, #tpu.memory_space<vmem>>, %arg24: memref<1x1x128xf32, #tpu.memory_space<vmem>>, %arg25: memref<1x128x32xbf16, #tpu.memory_space<vmem>>, %arg26: memref<1x1x32xf32, #tpu.memory_space<vmem>>, %arg27: memref<16x16xf32, #tpu.memory_space<vmem>>, %arg28: memref<16x32xf32, #tpu.memory_space<vmem>>) attributes {dimension_semantics = [#tpu.dimension_semantics<parallel>, #tpu.dimension_semantics<arbitrary>], iteration_bounds = array<i64: 1, 2>, scalar_prefetch = 0 : i64, scratch_operands = 1 : i64, tpu.core_type = #tpu.core_type<tc>, window_params = [{transform_indices = @transform_0, window_bounds = array<i64: 16, 192>}, {pipeline_mode = #tpu.pipeline_mode<synchronous>, transform_indices = @transform_1, window_bounds = array<i64: 8, 32>}, {pipeline_mode = #tpu.pipeline_mode<synchronous>, transform_indices = @transform_2, window_bounds = array<i64: 16, 16>}, {pipeline_mode = #tpu.pipeline_mode<synchronous>, transform_indices = @transform_3, window_bounds = array<i64: 1, 32>}, {pipeline_mode = #tpu.pipeline_mode<synchronous>, transform_indices = @transform_4, window_bounds = array<i64: 1, 32>}, {pipeline_mode = #tpu.pipeline_mode<synchronous>, transform_indices = @transform_5, window_bounds = array<i64: 192, 32>}, {pipeline_mode = #tpu.pipeline_mode<synchronous>, transform_indices = @transform_6, window_bounds = array<i64: 1, 32>}, {pipeline_mode = #tpu.pipeline_mode<synchronous>, transform_indices = @transform_7, window_bounds = array<i64: 1, 32>}, {pipeline_mode = #tpu.pipeline_mode<synchronous>, transform_indices = @transform_8, window_bounds = array<i64: 32, 16>}, {transform_indices = @transform_9, window_bounds = array<i64: 1, 1, 32>}, {transform_indices = @transform_10, window_bounds = array<i64: 1, 1, 32>}, {transform_indices = @transform_11, window_bounds = array<i64: 1, 32, 32>}, {transform_indices = @transform_12, window_bounds = array<i64: 1, 32, 32>}, {transform_indices = @transform_13, window_bounds = array<i64: 1, 32, 32>}, {transform_indices = @transform_14, window_bounds = array<i64: 1, 1, 32>}, {transform_indices = @transform_15, window_bounds = array<i64: 1, 1, 32>}, {transform_indices = @transform_16, window_bounds = array<i64: 1, 1, 32>}, {transform_indices = @transform_17, window_bounds = array<i64: 1, 32, 32>}, {transform_indices = @transform_18, window_bounds = array<i64: 1, 1, 32>}, {transform_indices = @transform_19, window_bounds = array<i64: 1, 1, 32>}, {transform_indices = @transform_20, window_bounds = array<i64: 1, 1, 32>}, {transform_indices = @transform_21, window_bounds = array<i64: 1, 32, 128>}, {transform_indices = @transform_22, window_bounds = array<i64: 1, 1, 128>}, {transform_indices = @transform_23, window_bounds = array<i64: 1, 128, 32>}, {transform_indices = @transform_24, window_bounds = array<i64: 1, 1, 32>}, {transform_indices = @transform_25, window_bounds = array<i64: 16, 16>}]} {
    %c0_i32 = arith.constant 0 : i32
    %0 = arith.cmpi eq, %arg1, %c0_i32 : i32
    %1 = arith.extui %0 : i1 to i32
    %c0_i32_0 = arith.constant 0 : i32
    %2 = arith.cmpi ne, %1, %c0_i32_0 : i32
    scf.if %2 {
      %c0_89 = arith.constant 0 : index
      %c0_90 = arith.constant 0 : index
      %202 = vector.load %arg2[%c0_89, %c0_90] : memref<16x192xf32, #tpu.memory_space<vmem>>, vector<16x192xf32>
      %c0_91 = arith.constant 0 : index
      %c0_92 = arith.constant 0 : index
      %203 = vector.load %arg7[%c0_91, %c0_92] : memref<192x32xbf16, #tpu.memory_space<vmem>>, vector<192x32xbf16>
      %204 = arith.truncf %202 : vector<16x192xf32> to vector<16x192xbf16>
      %cst_93 = arith.constant dense<0.000000e+00> : vector<16x32xf32>
      %205 = tpu.matmul %204, %203, %cst_93 {dimension_numbers = #tpu.dot_dimension_numbers<[1], [0], [0], [1], [0, 0, 1, 1], [], []>} : vector<16x192xbf16>, vector<192x32xbf16>, vector<16x32xf32> -> vector<16x32xf32>
      %c0_94 = arith.constant 0 : index
      %c0_95 = arith.constant 0 : index
      %206 = vector.load %arg3[%c0_94, %c0_95] : memref<8x32xf32, #tpu.memory_space<vmem>>, vector<8x32xf32>
      %207 = tpu.concatenate %206, %206 in 0 : vector<8x32xf32>, vector<8x32xf32> -> vector<16x32xf32>
      %208 = arith.addf %207, %205 : vector<16x32xf32>
      %cst_96 = arith.constant dense<0.000000e+00> : vector<16xf32>
      %209 = vector.multi_reduction <add>, %208, %cst_96 [1] : vector<16x32xf32> to vector<16xf32>
      %210 = vector.shape_cast %209 : vector<16xf32> to vector<16x1xf32>
      %cst_97 = arith.constant 3.200000e+01 : f32
      %211 = vector.broadcast %cst_97 : f32 to vector<16x1xf32>
      %212 = arith.divf %210, %211 : vector<16x1xf32>
      %213 = vector.broadcast %212 : vector<16x1xf32> to vector<16x32xf32>
      %214 = arith.subf %208, %213 : vector<16x32xf32>
      %215 = arith.mulf %214, %214 : vector<16x32xf32>
      %cst_98 = arith.constant dense<0.000000e+00> : vector<16xf32>
      %216 = vector.multi_reduction <add>, %215, %cst_98 [1] : vector<16x32xf32> to vector<16xf32>
      %217 = vector.shape_cast %216 : vector<16xf32> to vector<16x1xf32>
      %cst_99 = arith.constant 3.200000e+01 : f32
      %218 = vector.broadcast %cst_99 : f32 to vector<16x1xf32>
      %219 = arith.divf %217, %218 : vector<16x1xf32>
      %220 = vector.broadcast %212 : vector<16x1xf32> to vector<16x32xf32>
      %221 = arith.subf %208, %220 : vector<16x32xf32>
      %cst_100 = arith.constant 9.99999974E-6 : f32
      %222 = vector.broadcast %cst_100 : f32 to vector<16x1xf32>
      %223 = arith.addf %219, %222 : vector<16x1xf32>
      %224 = math.rsqrt %223 : vector<16x1xf32>
      %225 = vector.broadcast %224 : vector<16x1xf32> to vector<16x32xf32>
      %226 = arith.mulf %221, %225 : vector<16x32xf32>
      %c0_101 = arith.constant 0 : index
      %c0_102 = arith.constant 0 : index
      %227 = vector.load %arg5[%c0_101, %c0_102] : memref<1x32xf32, #tpu.memory_space<vmem>>, vector<1x32xf32>
      %228 = vector.broadcast %227 : vector<1x32xf32> to vector<16x32xf32>
      %229 = arith.mulf %226, %228 : vector<16x32xf32>
      %c0_103 = arith.constant 0 : index
      %c0_104 = arith.constant 0 : index
      %230 = vector.load %arg6[%c0_103, %c0_104] : memref<1x32xf32, #tpu.memory_space<vmem>>, vector<1x32xf32>
      %231 = vector.broadcast %230 : vector<1x32xf32> to vector<16x32xf32>
      %232 = arith.addf %229, %231 : vector<16x32xf32>
      %c0_105 = arith.constant 0 : index
      %c0_106 = arith.constant 0 : index
      %233 = vector.load %arg28[%c0_105, %c0_106] : memref<16x32xf32, #tpu.memory_space<vmem>>, vector<16x32xf32>
      tpu.vector_store %arg28[%c0_105, %c0_106], %232 {strides = array<i32>} : memref<16x32xf32, #tpu.memory_space<vmem>>, vector<16x32xf32>,
    } else {
    }
    %c0 = arith.constant 0 : index
    %c0_1 = arith.constant 0 : index
    %3 = vector.load %arg28[%c0, %c0_1] : memref<16x32xf32, #tpu.memory_space<vmem>>, vector<16x32xf32>
    %cst = arith.constant dense<0.000000e+00> : vector<16xf32>
    %4 = vector.multi_reduction <add>, %3, %cst [1] : vector<16x32xf32> to vector<16xf32>
    %5 = vector.shape_cast %4 : vector<16xf32> to vector<16x1xf32>
    %cst_2 = arith.constant 3.200000e+01 : f32
    %6 = vector.broadcast %cst_2 : f32 to vector<16x1xf32>
    %7 = arith.divf %5, %6 : vector<16x1xf32>
    %8 = vector.broadcast %7 : vector<16x1xf32> to vector<16x32xf32>
    %9 = arith.subf %3, %8 : vector<16x32xf32>
    %10 = arith.mulf %9, %9 : vector<16x32xf32>
    %cst_3 = arith.constant dense<0.000000e+00> : vector<16xf32>
    %11 = vector.multi_reduction <add>, %10, %cst_3 [1] : vector<16x32xf32> to vector<16xf32>
    %12 = vector.shape_cast %11 : vector<16xf32> to vector<16x1xf32>
    %cst_4 = arith.constant 3.200000e+01 : f32
    %13 = vector.broadcast %cst_4 : f32 to vector<16x1xf32>
    %14 = arith.divf %12, %13 : vector<16x1xf32>
    %15 = vector.broadcast %7 : vector<16x1xf32> to vector<16x32xf32>
    %16 = arith.subf %3, %15 : vector<16x32xf32>
    %cst_5 = arith.constant 9.99999974E-6 : f32
    %17 = vector.broadcast %cst_5 : f32 to vector<16x1xf32>
    %18 = arith.addf %14, %17 : vector<16x1xf32>
    %19 = math.rsqrt %18 : vector<16x1xf32>
    %20 = vector.broadcast %19 : vector<16x1xf32> to vector<16x32xf32>
    %21 = arith.mulf %16, %20 : vector<16x32xf32>
    %c0_6 = arith.constant 0 : index
    %c0_7 = arith.constant 0 : index
    %c0_8 = arith.constant 0 : index
    %22 = vector.load %arg11[%c0_6, %c0_7, %c0_8] : memref<1x1x32xf32, #tpu.memory_space<vmem>>, vector<1x1x32xf32>
    %23 = vector.shape_cast %22 : vector<1x1x32xf32> to vector<1x32xf32>
    %24 = vector.broadcast %23 : vector<1x32xf32> to vector<16x32xf32>
    %25 = arith.mulf %21, %24 : vector<16x32xf32>
    %c0_9 = arith.constant 0 : index
    %c0_10 = arith.constant 0 : index
    %c0_11 = arith.constant 0 : index
    %26 = vector.load %arg12[%c0_9, %c0_10, %c0_11] : memref<1x1x32xf32, #tpu.memory_space<vmem>>, vector<1x1x32xf32>
    %27 = vector.shape_cast %26 : vector<1x1x32xf32> to vector<1x32xf32>
    %28 = vector.broadcast %27 : vector<1x32xf32> to vector<16x32xf32>
    %29 = arith.addf %25, %28 : vector<16x32xf32>
    %c0_12 = arith.constant 0 : index
    %c0_13 = arith.constant 0 : index
    %c0_14 = arith.constant 0 : index
    %30 = vector.load %arg13[%c0_12, %c0_13, %c0_14] : memref<1x32x32xbf16, #tpu.memory_space<vmem>>, vector<1x32x32xbf16>
    %31 = vector.shape_cast %30 : vector<1x32x32xbf16> to vector<32x32xbf16>
    %32 = arith.truncf %29 : vector<16x32xf32> to vector<16x32xbf16>
    %cst_15 = arith.constant dense<0.000000e+00> : vector<16x32xf32>
    %33 = tpu.matmul %32, %31, %cst_15 {dimension_numbers = #tpu.dot_dimension_numbers<[1], [0], [0], [1], [0, 0, 1, 1], [], []>} : vector<16x32xbf16>, vector<32x32xbf16>, vector<16x32xf32> -> vector<16x32xf32>
    %c0_16 = arith.constant 0 : index
    %c0_17 = arith.constant 0 : index
    %c0_18 = arith.constant 0 : index
    %34 = vector.load %arg16[%c0_16, %c0_17, %c0_18] : memref<1x1x32xf32, #tpu.memory_space<vmem>>, vector<1x1x32xf32>
    %35 = vector.shape_cast %34 : vector<1x1x32xf32> to vector<1x32xf32>
    %36 = vector.broadcast %35 : vector<1x32xf32> to vector<16x32xf32>
    %37 = arith.addf %33, %36 : vector<16x32xf32>
    %cst_19 = arith.constant 0.353553385 : f32
    %38 = vector.broadcast %cst_19 : f32 to vector<16x32xf32>
    %39 = arith.mulf %37, %38 : vector<16x32xf32>
    %c0_20 = arith.constant 0 : index
    %c0_21 = arith.constant 0 : index
    %c0_22 = arith.constant 0 : index
    %40 = vector.load %arg14[%c0_20, %c0_21, %c0_22] : memref<1x32x32xbf16, #tpu.memory_space<vmem>>, vector<1x32x32xbf16>
    %41 = vector.shape_cast %40 : vector<1x32x32xbf16> to vector<32x32xbf16>
    %42 = arith.truncf %29 : vector<16x32xf32> to vector<16x32xbf16>
    %cst_23 = arith.constant dense<0.000000e+00> : vector<16x32xf32>
    %43 = tpu.matmul %42, %41, %cst_23 {dimension_numbers = #tpu.dot_dimension_numbers<[1], [0], [0], [1], [0, 0, 1, 1], [], []>} : vector<16x32xbf16>, vector<32x32xbf16>, vector<16x32xf32> -> vector<16x32xf32>
    %c0_24 = arith.constant 0 : index
    %c0_25 = arith.constant 0 : index
    %c0_26 = arith.constant 0 : index
    %44 = vector.load %arg17[%c0_24, %c0_25, %c0_26] : memref<1x1x32xf32, #tpu.memory_space<vmem>>, vector<1x1x32xf32>
    %45 = vector.shape_cast %44 : vector<1x1x32xf32> to vector<1x32xf32>
    %46 = vector.broadcast %45 : vector<1x32xf32> to vector<16x32xf32>
    %47 = arith.addf %43, %46 : vector<16x32xf32>
    %c0_27 = arith.constant 0 : index
    %c0_28 = arith.constant 0 : index
    %c0_29 = arith.constant 0 : index
    %48 = vector.load %arg15[%c0_27, %c0_28, %c0_29] : memref<1x32x32xbf16, #tpu.memory_space<vmem>>, vector<1x32x32xbf16>
    %49 = vector.shape_cast %48 : vector<1x32x32xbf16> to vector<32x32xbf16>
    %50 = arith.truncf %29 : vector<16x32xf32> to vector<16x32xbf16>
    %cst_30 = arith.constant dense<0.000000e+00> : vector<16x32xf32>
    %51 = tpu.matmul %50, %49, %cst_30 {dimension_numbers = #tpu.dot_dimension_numbers<[1], [0], [0], [1], [0, 0, 1, 1], [], []>} : vector<16x32xbf16>, vector<32x32xbf16>, vector<16x32xf32> -> vector<16x32xf32>
    %c0_31 = arith.constant 0 : index
    %c0_32 = arith.constant 0 : index
    %c0_33 = arith.constant 0 : index
    %52 = vector.load %arg18[%c0_31, %c0_32, %c0_33] : memref<1x1x32xf32, #tpu.memory_space<vmem>>, vector<1x1x32xf32>
    %53 = vector.shape_cast %52 : vector<1x1x32xf32> to vector<1x32xf32>
    %54 = vector.broadcast %53 : vector<1x32xf32> to vector<16x32xf32>
    %55 = arith.addf %51, %54 : vector<16x32xf32>
    %c0_34 = arith.constant 0 : index
    %c0_35 = arith.constant 0 : index
    %56 = vector.load %arg4[%c0_34, %c0_35] : memref<16x16xf32, #tpu.memory_space<vmem>>, vector<16x16xf32>
    %57 = vector.extract_strided_slice %39 {offsets = [0, 0], sizes = [16, 8], strides = [1, 1]} : vector<16x32xf32> to vector<16x8xf32>
    %58 = arith.truncf %57 : vector<16x8xf32> to vector<16x8xbf16>
    %59 = vector.extract_strided_slice %47 {offsets = [0, 0], sizes = [16, 8], strides = [1, 1]} : vector<16x32xf32> to vector<16x8xf32>
    %60 = arith.truncf %59 : vector<16x8xf32> to vector<16x8xbf16>
    %61 = vector.extract_strided_slice %55 {offsets = [0, 0], sizes = [16, 8], strides = [1, 1]} : vector<16x32xf32> to vector<16x8xf32>
    %62 = arith.truncf %61 : vector<16x8xf32> to vector<16x8xbf16>
    %cst_36 = arith.constant dense<0.000000e+00> : vector<16x16xf32>
    %63 = tpu.matmul %58, %60, %cst_36 {dimension_numbers = #tpu.dot_dimension_numbers<[1], [1], [0], [0], [0, 0, 1, 0], [], []>} : vector<16x8xbf16>, vector<16x8xbf16>, vector<16x16xf32> -> vector<16x16xf32>
    %64 = arith.addf %63, %56 : vector<16x16xf32>
    %cst_37 = arith.constant dense<0xFF800000> : vector<16xf32>
    %65 = vector.multi_reduction <maximumf>, %64, %cst_37 [1] : vector<16x16xf32> to vector<16xf32>
    %66 = vector.shape_cast %65 : vector<16xf32> to vector<16x1xf32>
    %67 = vector.broadcast %66 : vector<16x1xf32> to vector<16x16xf32>
    %68 = arith.subf %64, %67 : vector<16x16xf32>
    %69 = math.exp %68 : vector<16x16xf32>
    %cst_38 = arith.constant dense<0.000000e+00> : vector<16xf32>
    %70 = vector.multi_reduction <add>, %69, %cst_38 [1] : vector<16x16xf32> to vector<16xf32>
    %71 = vector.shape_cast %70 : vector<16xf32> to vector<16x1xf32>
    %72 = tpu.reciprocal %71 {approx = true} : vector<16x1xf32> -> vector<16x1xf32>
    %73 = vector.broadcast %72 : vector<16x1xf32> to vector<16x16xf32>
    %74 = arith.mulf %69, %73 : vector<16x16xf32>
    %75 = arith.truncf %74 : vector<16x16xf32> to vector<16x16xbf16>
    %cst_39 = arith.constant dense<0.000000e+00> : vector<16x8xf32>
    %76 = tpu.matmul %75, %62, %cst_39 {dimension_numbers = #tpu.dot_dimension_numbers<[1], [0], [0], [1], [0, 0, 1, 1], [], []>} : vector<16x16xbf16>, vector<16x8xbf16>, vector<16x8xf32> -> vector<16x8xf32>
    %77 = vector.extract_strided_slice %39 {offsets = [0, 8], sizes = [16, 8], strides = [1, 1]} : vector<16x32xf32> to vector<16x8xf32>
    %78 = arith.truncf %77 : vector<16x8xf32> to vector<16x8xbf16>
    %79 = vector.extract_strided_slice %47 {offsets = [0, 8], sizes = [16, 8], strides = [1, 1]} : vector<16x32xf32> to vector<16x8xf32>
    %80 = arith.truncf %79 : vector<16x8xf32> to vector<16x8xbf16>
    %81 = vector.extract_strided_slice %55 {offsets = [0, 8], sizes = [16, 8], strides = [1, 1]} : vector<16x32xf32> to vector<16x8xf32>
    %82 = arith.truncf %81 : vector<16x8xf32> to vector<16x8xbf16>
    %cst_40 = arith.constant dense<0.000000e+00> : vector<16x16xf32>
    %83 = tpu.matmul %78, %80, %cst_40 {dimension_numbers = #tpu.dot_dimension_numbers<[1], [1], [0], [0], [0, 0, 1, 0], [], []>} : vector<16x8xbf16>, vector<16x8xbf16>, vector<16x16xf32> -> vector<16x16xf32>
    %84 = arith.addf %83, %56 : vector<16x16xf32>
    %cst_41 = arith.constant dense<0xFF800000> : vector<16xf32>
    %85 = vector.multi_reduction <maximumf>, %84, %cst_41 [1] : vector<16x16xf32> to vector<16xf32>
    %86 = vector.shape_cast %85 : vector<16xf32> to vector<16x1xf32>
    %87 = vector.broadcast %86 : vector<16x1xf32> to vector<16x16xf32>
    %88 = arith.subf %84, %87 : vector<16x16xf32>
    %89 = math.exp %88 : vector<16x16xf32>
    %cst_42 = arith.constant dense<0.000000e+00> : vector<16xf32>
    %90 = vector.multi_reduction <add>, %89, %cst_42 [1] : vector<16x16xf32> to vector<16xf32>
    %91 = vector.shape_cast %90 : vector<16xf32> to vector<16x1xf32>
    %92 = tpu.reciprocal %91 {approx = true} : vector<16x1xf32> -> vector<16x1xf32>
    %93 = vector.broadcast %92 : vector<16x1xf32> to vector<16x16xf32>
    %94 = arith.mulf %89, %93 : vector<16x16xf32>
    %95 = arith.truncf %94 : vector<16x16xf32> to vector<16x16xbf16>
    %cst_43 = arith.constant dense<0.000000e+00> : vector<16x8xf32>
    %96 = tpu.matmul %95, %82, %cst_43 {dimension_numbers = #tpu.dot_dimension_numbers<[1], [0], [0], [1], [0, 0, 1, 1], [], []>} : vector<16x16xbf16>, vector<16x8xbf16>, vector<16x8xf32> -> vector<16x8xf32>
    %97 = vector.extract_strided_slice %39 {offsets = [0, 16], sizes = [16, 8], strides = [1, 1]} : vector<16x32xf32> to vector<16x8xf32>
    %98 = arith.truncf %97 : vector<16x8xf32> to vector<16x8xbf16>
    %99 = vector.extract_strided_slice %47 {offsets = [0, 16], sizes = [16, 8], strides = [1, 1]} : vector<16x32xf32> to vector<16x8xf32>
    %100 = arith.truncf %99 : vector<16x8xf32> to vector<16x8xbf16>
    %101 = vector.extract_strided_slice %55 {offsets = [0, 16], sizes = [16, 8], strides = [1, 1]} : vector<16x32xf32> to vector<16x8xf32>
    %102 = arith.truncf %101 : vector<16x8xf32> to vector<16x8xbf16>
    %cst_44 = arith.constant dense<0.000000e+00> : vector<16x16xf32>
    %103 = tpu.matmul %98, %100, %cst_44 {dimension_numbers = #tpu.dot_dimension_numbers<[1], [1], [0], [0], [0, 0, 1, 0], [], []>} : vector<16x8xbf16>, vector<16x8xbf16>, vector<16x16xf32> -> vector<16x16xf32>
    %104 = arith.addf %103, %56 : vector<16x16xf32>
    %cst_45 = arith.constant dense<0xFF800000> : vector<16xf32>
    %105 = vector.multi_reduction <maximumf>, %104, %cst_45 [1] : vector<16x16xf32> to vector<16xf32>
    %106 = vector.shape_cast %105 : vector<16xf32> to vector<16x1xf32>
    %107 = vector.broadcast %106 : vector<16x1xf32> to vector<16x16xf32>
    %108 = arith.subf %104, %107 : vector<16x16xf32>
    %109 = math.exp %108 : vector<16x16xf32>
    %cst_46 = arith.constant dense<0.000000e+00> : vector<16xf32>
    %110 = vector.multi_reduction <add>, %109, %cst_46 [1] : vector<16x16xf32> to vector<16xf32>
    %111 = vector.shape_cast %110 : vector<16xf32> to vector<16x1xf32>
    %112 = tpu.reciprocal %111 {approx = true} : vector<16x1xf32> -> vector<16x1xf32>
    %113 = vector.broadcast %112 : vector<16x1xf32> to vector<16x16xf32>
    %114 = arith.mulf %109, %113 : vector<16x16xf32>
    %115 = arith.truncf %114 : vector<16x16xf32> to vector<16x16xbf16>
    %cst_47 = arith.constant dense<0.000000e+00> : vector<16x8xf32>
    %116 = tpu.matmul %115, %102, %cst_47 {dimension_numbers = #tpu.dot_dimension_numbers<[1], [0], [0], [1], [0, 0, 1, 1], [], []>} : vector<16x16xbf16>, vector<16x8xbf16>, vector<16x8xf32> -> vector<16x8xf32>
    %117 = vector.extract_strided_slice %39 {offsets = [0, 24], sizes = [16, 8], strides = [1, 1]} : vector<16x32xf32> to vector<16x8xf32>
    %118 = arith.truncf %117 : vector<16x8xf32> to vector<16x8xbf16>
    %119 = vector.extract_strided_slice %47 {offsets = [0, 24], sizes = [16, 8], strides = [1, 1]} : vector<16x32xf32> to vector<16x8xf32>
    %120 = arith.truncf %119 : vector<16x8xf32> to vector<16x8xbf16>
    %121 = vector.extract_strided_slice %55 {offsets = [0, 24], sizes = [16, 8], strides = [1, 1]} : vector<16x32xf32> to vector<16x8xf32>
    %122 = arith.truncf %121 : vector<16x8xf32> to vector<16x8xbf16>
    %cst_48 = arith.constant dense<0.000000e+00> : vector<16x16xf32>
    %123 = tpu.matmul %118, %120, %cst_48 {dimension_numbers = #tpu.dot_dimension_numbers<[1], [1], [0], [0], [0, 0, 1, 0], [], []>} : vector<16x8xbf16>, vector<16x8xbf16>, vector<16x16xf32> -> vector<16x16xf32>
    %124 = arith.addf %123, %56 : vector<16x16xf32>
    %cst_49 = arith.constant dense<0xFF800000> : vector<16xf32>
    %125 = vector.multi_reduction <maximumf>, %124, %cst_49 [1] : vector<16x16xf32> to vector<16xf32>
    %126 = vector.shape_cast %125 : vector<16xf32> to vector<16x1xf32>
    %127 = vector.broadcast %126 : vector<16x1xf32> to vector<16x16xf32>
    %128 = arith.subf %124, %127 : vector<16x16xf32>
    %129 = math.exp %128 : vector<16x16xf32>
    %cst_50 = arith.constant dense<0.000000e+00> : vector<16xf32>
    %130 = vector.multi_reduction <add>, %129, %cst_50 [1] : vector<16x16xf32> to vector<16xf32>
    %131 = vector.shape_cast %130 : vector<16xf32> to vector<16x1xf32>
    %132 = tpu.reciprocal %131 {approx = true} : vector<16x1xf32> -> vector<16x1xf32>
    %133 = vector.broadcast %132 : vector<16x1xf32> to vector<16x16xf32>
    %134 = arith.mulf %129, %133 : vector<16x16xf32>
    %135 = arith.truncf %134 : vector<16x16xf32> to vector<16x16xbf16>
    %cst_51 = arith.constant dense<0.000000e+00> : vector<16x8xf32>
    %136 = tpu.matmul %135, %122, %cst_51 {dimension_numbers = #tpu.dot_dimension_numbers<[1], [0], [0], [1], [0, 0, 1, 1], [], []>} : vector<16x16xbf16>, vector<16x8xbf16>, vector<16x8xf32> -> vector<16x8xf32>
    %137 = tpu.concatenate %76, %96, %116, %136 in 1 : vector<16x8xf32>, vector<16x8xf32>, vector<16x8xf32>, vector<16x8xf32> -> vector<16x32xf32>
    %c0_52 = arith.constant 0 : index
    %c0_53 = arith.constant 0 : index
    %c0_54 = arith.constant 0 : index
    %138 = vector.load %arg19[%c0_52, %c0_53, %c0_54] : memref<1x32x32xbf16, #tpu.memory_space<vmem>>, vector<1x32x32xbf16>
    %139 = vector.shape_cast %138 : vector<1x32x32xbf16> to vector<32x32xbf16>
    %140 = arith.truncf %137 : vector<16x32xf32> to vector<16x32xbf16>
    %cst_55 = arith.constant dense<0.000000e+00> : vector<16x32xf32>
    %141 = tpu.matmul %140, %139, %cst_55 {dimension_numbers = #tpu.dot_dimension_numbers<[1], [0], [0], [1], [0, 0, 1, 1], [], []>} : vector<16x32xbf16>, vector<32x32xbf16>, vector<16x32xf32> -> vector<16x32xf32>
    %c0_56 = arith.constant 0 : index
    %c0_57 = arith.constant 0 : index
    %c0_58 = arith.constant 0 : index
    %142 = vector.load %arg20[%c0_56, %c0_57, %c0_58] : memref<1x1x32xf32, #tpu.memory_space<vmem>>, vector<1x1x32xf32>
    %143 = vector.shape_cast %142 : vector<1x1x32xf32> to vector<1x32xf32>
    %144 = vector.broadcast %143 : vector<1x32xf32> to vector<16x32xf32>
    %145 = arith.addf %141, %144 : vector<16x32xf32>
    %146 = arith.addf %3, %145 : vector<16x32xf32>
    %cst_59 = arith.constant dense<0.000000e+00> : vector<16xf32>
    %147 = vector.multi_reduction <add>, %146, %cst_59 [1] : vector<16x32xf32> to vector<16xf32>
    %148 = vector.shape_cast %147 : vector<16xf32> to vector<16x1xf32>
    %cst_60 = arith.constant 3.200000e+01 : f32
    %149 = vector.broadcast %cst_60 : f32 to vector<16x1xf32>
    %150 = arith.divf %148, %149 : vector<16x1xf32>
    %151 = vector.broadcast %150 : vector<16x1xf32> to vector<16x32xf32>
    %152 = arith.subf %146, %151 : vector<16x32xf32>
    %153 = arith.mulf %152, %152 : vector<16x32xf32>
    %cst_61 = arith.constant dense<0.000000e+00> : vector<16xf32>
    %154 = vector.multi_reduction <add>, %153, %cst_61 [1] : vector<16x32xf32> to vector<16xf32>
    %155 = vector.shape_cast %154 : vector<16xf32> to vector<16x1xf32>
    %cst_62 = arith.constant 3.200000e+01 : f32
    %156 = vector.broadcast %cst_62 : f32 to vector<16x1xf32>
    %157 = arith.divf %155, %156 : vector<16x1xf32>
    %158 = vector.broadcast %150 : vector<16x1xf32> to vector<16x32xf32>
    %159 = arith.subf %146, %158 : vector<16x32xf32>
    %cst_63 = arith.constant 9.99999974E-6 : f32
    %160 = vector.broadcast %cst_63 : f32 to vector<16x1xf32>
    %161 = arith.addf %157, %160 : vector<16x1xf32>
    %162 = math.rsqrt %161 : vector<16x1xf32>
    %163 = vector.broadcast %162 : vector<16x1xf32> to vector<16x32xf32>
    %164 = arith.mulf %159, %163 : vector<16x32xf32>
    %c0_64 = arith.constant 0 : index
    %c0_65 = arith.constant 0 : index
    %c0_66 = arith.constant 0 : index
    %165 = vector.load %arg21[%c0_64, %c0_65, %c0_66] : memref<1x1x32xf32, #tpu.memory_space<vmem>>, vector<1x1x32xf32>
    %166 = vector.shape_cast %165 : vector<1x1x32xf32> to vector<1x32xf32>
    %167 = vector.broadcast %166 : vector<1x32xf32> to vector<16x32xf32>
    %168 = arith.mulf %164, %167 : vector<16x32xf32>
    %c0_67 = arith.constant 0 : index
    %c0_68 = arith.constant 0 : index
    %c0_69 = arith.constant 0 : index
    %169 = vector.load %arg22[%c0_67, %c0_68, %c0_69] : memref<1x1x32xf32, #tpu.memory_space<vmem>>, vector<1x1x32xf32>
    %170 = vector.shape_cast %169 : vector<1x1x32xf32> to vector<1x32xf32>
    %171 = vector.broadcast %170 : vector<1x32xf32> to vector<16x32xf32>
    %172 = arith.addf %168, %171 : vector<16x32xf32>
    %c0_70 = arith.constant 0 : index
    %c0_71 = arith.constant 0 : index
    %c0_72 = arith.constant 0 : index
    %173 = vector.load %arg23[%c0_70, %c0_71, %c0_72] : memref<1x32x128xbf16, #tpu.memory_space<vmem>>, vector<1x32x128xbf16>
    %174 = vector.shape_cast %173 : vector<1x32x128xbf16> to vector<32x128xbf16>
    %175 = arith.truncf %172 : vector<16x32xf32> to vector<16x32xbf16>
    %cst_73 = arith.constant dense<0.000000e+00> : vector<16x128xf32>
    %176 = tpu.matmul %175, %174, %cst_73 {dimension_numbers = #tpu.dot_dimension_numbers<[1], [0], [0], [1], [0, 0, 1, 1], [], []>} : vector<16x32xbf16>, vector<32x128xbf16>, vector<16x128xf32> -> vector<16x128xf32>
    %c0_74 = arith.constant 0 : index
    %c0_75 = arith.constant 0 : index
    %c0_76 = arith.constant 0 : index
    %177 = vector.load %arg24[%c0_74, %c0_75, %c0_76] : memref<1x1x128xf32, #tpu.memory_space<vmem>>, vector<1x1x128xf32>
    %178 = vector.shape_cast %177 : vector<1x1x128xf32> to vector<1x128xf32>
    %179 = vector.broadcast %178 : vector<1x128xf32> to vector<16x128xf32>
    %180 = arith.addf %176, %179 : vector<16x128xf32>
    %cst_77 = arith.constant 1.702000e+00 : f32
    %181 = vector.broadcast %cst_77 : f32 to vector<16x128xf32>
    %182 = arith.mulf %181, %180 : vector<16x128xf32>
    %183 = arith.negf %182 : vector<16x128xf32>
    %184 = math.exp %183 : vector<16x128xf32>
    %cst_78 = arith.constant 1.000000e+00 : f32
    %185 = vector.broadcast %cst_78 : f32 to vector<16x128xf32>
    %186 = arith.addf %185, %184 : vector<16x128xf32>
    %187 = arith.divf %185, %186 : vector<16x128xf32>
    %188 = arith.mulf %180, %187 : vector<16x128xf32>
    %c0_79 = arith.constant 0 : index
    %c0_80 = arith.constant 0 : index
    %c0_81 = arith.constant 0 : index
    %189 = vector.load %arg25[%c0_79, %c0_80, %c0_81] : memref<1x128x32xbf16, #tpu.memory_space<vmem>>, vector<1x128x32xbf16>
    %190 = vector.shape_cast %189 : vector<1x128x32xbf16> to vector<128x32xbf16>
    %191 = arith.truncf %188 : vector<16x128xf32> to vector<16x128xbf16>
    %cst_82 = arith.constant dense<0.000000e+00> : vector<16x32xf32>
    %192 = tpu.matmul %191, %190, %cst_82 {dimension_numbers = #tpu.dot_dimension_numbers<[1], [0], [0], [1], [0, 0, 1, 1], [], []>} : vector<16x128xbf16>, vector<128x32xbf16>, vector<16x32xf32> -> vector<16x32xf32>
    %c0_83 = arith.constant 0 : index
    %c0_84 = arith.constant 0 : index
    %c0_85 = arith.constant 0 : index
    %193 = vector.load %arg26[%c0_83, %c0_84, %c0_85] : memref<1x1x32xf32, #tpu.memory_space<vmem>>, vector<1x1x32xf32>
    %194 = vector.shape_cast %193 : vector<1x1x32xf32> to vector<1x32xf32>
    %195 = vector.broadcast %194 : vector<1x32xf32> to vector<16x32xf32>
    %196 = arith.addf %192, %195 : vector<16x32xf32>
    %197 = arith.addf %146, %196 : vector<16x32xf32>
    %c0_86 = arith.constant 0 : index
    %c0_87 = arith.constant 0 : index
    %198 = vector.load %arg28[%c0_86, %c0_87] : memref<16x32xf32, #tpu.memory_space<vmem>>, vector<16x32xf32>
    tpu.vector_store %arg28[%c0_86, %c0_87], %197 {strides = array<i32>} : memref<16x32xf32, #tpu.memory_space<vmem>>, vector<16x32xf32>,
    %c1_i32 = arith.constant 1 : i32
    %199 = arith.cmpi eq, %arg1, %c1_i32 : i32
    %200 = arith.extui %199 : i1 to i32
    %c0_i32_88 = arith.constant 0 : i32
    %201 = arith.cmpi ne, %200, %c0_i32_88 : i32
    scf.if %201 {
      %cst_89 = arith.constant dense<0.000000e+00> : vector<16xf32>
      %202 = vector.multi_reduction <add>, %197, %cst_89 [1] : vector<16x32xf32> to vector<16xf32>
      %203 = vector.shape_cast %202 : vector<16xf32> to vector<16x1xf32>
      %cst_90 = arith.constant 3.200000e+01 : f32
      %204 = vector.broadcast %cst_90 : f32 to vector<16x1xf32>
      %205 = arith.divf %203, %204 : vector<16x1xf32>
      %206 = vector.broadcast %205 : vector<16x1xf32> to vector<16x32xf32>
      %207 = arith.subf %197, %206 : vector<16x32xf32>
      %208 = arith.mulf %207, %207 : vector<16x32xf32>
      %cst_91 = arith.constant dense<0.000000e+00> : vector<16xf32>
      %209 = vector.multi_reduction <add>, %208, %cst_91 [1] : vector<16x32xf32> to vector<16xf32>
      %210 = vector.shape_cast %209 : vector<16xf32> to vector<16x1xf32>
      %cst_92 = arith.constant 3.200000e+01 : f32
      %211 = vector.broadcast %cst_92 : f32 to vector<16x1xf32>
      %212 = arith.divf %210, %211 : vector<16x1xf32>
      %213 = vector.broadcast %205 : vector<16x1xf32> to vector<16x32xf32>
      %214 = arith.subf %197, %213 : vector<16x32xf32>
      %cst_93 = arith.constant 9.99999974E-6 : f32
      %215 = vector.broadcast %cst_93 : f32 to vector<16x1xf32>
      %216 = arith.addf %212, %215 : vector<16x1xf32>
      %217 = math.rsqrt %216 : vector<16x1xf32>
      %218 = vector.broadcast %217 : vector<16x1xf32> to vector<16x32xf32>
      %219 = arith.mulf %214, %218 : vector<16x32xf32>
      %c0_94 = arith.constant 0 : index
      %c0_95 = arith.constant 0 : index
      %220 = vector.load %arg8[%c0_94, %c0_95] : memref<1x32xf32, #tpu.memory_space<vmem>>, vector<1x32xf32>
      %221 = vector.broadcast %220 : vector<1x32xf32> to vector<16x32xf32>
      %222 = arith.mulf %219, %221 : vector<16x32xf32>
      %c0_96 = arith.constant 0 : index
      %c0_97 = arith.constant 0 : index
      %223 = vector.load %arg9[%c0_96, %c0_97] : memref<1x32xf32, #tpu.memory_space<vmem>>, vector<1x32xf32>
      %224 = vector.broadcast %223 : vector<1x32xf32> to vector<16x32xf32>
      %225 = arith.addf %222, %224 : vector<16x32xf32>
      %c0_98 = arith.constant 0 : index
      %c0_99 = arith.constant 0 : index
      %226 = vector.load %arg10[%c0_98, %c0_99] : memref<32x16xbf16, #tpu.memory_space<vmem>>, vector<32x16xbf16>
      %227 = arith.truncf %225 : vector<16x32xf32> to vector<16x32xbf16>
      %cst_100 = arith.constant dense<0.000000e+00> : vector<16x16xf32>
      %228 = tpu.matmul %227, %226, %cst_100 {dimension_numbers = #tpu.dot_dimension_numbers<[1], [0], [0], [1], [0, 0, 1, 1], [], []>} : vector<16x32xbf16>, vector<32x16xbf16>, vector<16x16xf32> -> vector<16x16xf32>
      %c0_101 = arith.constant 0 : index
      %c0_102 = arith.constant 0 : index
      %229 = vector.load %arg27[%c0_101, %c0_102] : memref<16x16xf32, #tpu.memory_space<vmem>>, vector<16x16xf32>
      tpu.vector_store %arg27[%c0_101, %c0_102], %228 {strides = array<i32>} : memref<16x16xf32, #tpu.memory_space<vmem>>, vector<16x16xf32>,
    } else {
    }
    return
  }
  func.func @transform_0(%arg0: i32, %arg1: i32) -> (i32, i32) {
    %c0_i32 = arith.constant 0 : i32
    %c0_i32_0 = arith.constant 0 : i32
    return %arg0, %c0_i32 : i32, i32
  }
  func.func @transform_1(%arg0: i32, %arg1: i32) -> (i32, i32) {
    %c0_i32 = arith.constant 0 : i32
    %c0_i32_0 = arith.constant 0 : i32
    %c0_i32_1 = arith.constant 0 : i32
    return %c0_i32, %c0_i32_0 : i32, i32
  }
  func.func @transform_2(%arg0: i32, %arg1: i32) -> (i32, i32) {
    %c0_i32 = arith.constant 0 : i32
    %c0_i32_0 = arith.constant 0 : i32
    %c0_i32_1 = arith.constant 0 : i32
    return %c0_i32, %c0_i32_0 : i32, i32
  }
  func.func @transform_3(%arg0: i32, %arg1: i32) -> (i32, i32) {
    %c0_i32 = arith.constant 0 : i32
    %c0_i32_0 = arith.constant 0 : i32
    %c0_i32_1 = arith.constant 0 : i32
    return %c0_i32, %c0_i32_0 : i32, i32
  }
  func.func @transform_4(%arg0: i32, %arg1: i32) -> (i32, i32) {
    %c0_i32 = arith.constant 0 : i32
    %c0_i32_0 = arith.constant 0 : i32
    %c0_i32_1 = arith.constant 0 : i32
    return %c0_i32, %c0_i32_0 : i32, i32
  }
  func.func @transform_5(%arg0: i32, %arg1: i32) -> (i32, i32) {
    %c0_i32 = arith.constant 0 : i32
    %c0_i32_0 = arith.constant 0 : i32
    %c0_i32_1 = arith.constant 0 : i32
    return %c0_i32, %c0_i32_0 : i32, i32
  }
  func.func @transform_6(%arg0: i32, %arg1: i32) -> (i32, i32) {
    %c0_i32 = arith.constant 0 : i32
    %c0_i32_0 = arith.constant 0 : i32
    %c0_i32_1 = arith.constant 0 : i32
    return %c0_i32, %c0_i32_0 : i32, i32
  }
  func.func @transform_7(%arg0: i32, %arg1: i32) -> (i32, i32) {
    %c0_i32 = arith.constant 0 : i32
    %c0_i32_0 = arith.constant 0 : i32
    %c0_i32_1 = arith.constant 0 : i32
    return %c0_i32, %c0_i32_0 : i32, i32
  }
  func.func @transform_8(%arg0: i32, %arg1: i32) -> (i32, i32) {
    %c0_i32 = arith.constant 0 : i32
    %c0_i32_0 = arith.constant 0 : i32
    %c0_i32_1 = arith.constant 0 : i32
    return %c0_i32, %c0_i32_0 : i32, i32
  }
  func.func @transform_9(%arg0: i32, %arg1: i32) -> (i32, i32, i32) {
    %c0_i32 = arith.constant 0 : i32
    %c0_i32_0 = arith.constant 0 : i32
    %c0_i32_1 = arith.constant 0 : i32
    return %arg1, %c0_i32, %c0_i32_0 : i32, i32, i32
  }
  func.func @transform_10(%arg0: i32, %arg1: i32) -> (i32, i32, i32) {
    %c0_i32 = arith.constant 0 : i32
    %c0_i32_0 = arith.constant 0 : i32
    %c0_i32_1 = arith.constant 0 : i32
    return %arg1, %c0_i32, %c0_i32_0 : i32, i32, i32
  }
  func.func @transform_11(%arg0: i32, %arg1: i32) -> (i32, i32, i32) {
    %c0_i32 = arith.constant 0 : i32
    %c0_i32_0 = arith.constant 0 : i32
    %c0_i32_1 = arith.constant 0 : i32
    return %arg1, %c0_i32, %c0_i32_0 : i32, i32, i32
  }
  func.func @transform_12(%arg0: i32, %arg1: i32) -> (i32, i32, i32) {
    %c0_i32 = arith.constant 0 : i32
    %c0_i32_0 = arith.constant 0 : i32
    %c0_i32_1 = arith.constant 0 : i32
    return %arg1, %c0_i32, %c0_i32_0 : i32, i32, i32
  }
  func.func @transform_13(%arg0: i32, %arg1: i32) -> (i32, i32, i32) {
    %c0_i32 = arith.constant 0 : i32
    %c0_i32_0 = arith.constant 0 : i32
    %c0_i32_1 = arith.constant 0 : i32
    return %arg1, %c0_i32, %c0_i32_0 : i32, i32, i32
  }
  func.func @transform_14(%arg0: i32, %arg1: i32) -> (i32, i32, i32) {
    %c0_i32 = arith.constant 0 : i32
    %c0_i32_0 = arith.constant 0 : i32
    %c0_i32_1 = arith.constant 0 : i32
    return %arg1, %c0_i32, %c0_i32_0 : i32, i32, i32
  }
  func.func @transform_15(%arg0: i32, %arg1: i32) -> (i32, i32, i32) {
    %c0_i32 = arith.constant 0 : i32
    %c0_i32_0 = arith.constant 0 : i32
    %c0_i32_1 = arith.constant 0 : i32
    return %arg1, %c0_i32, %c0_i32_0 : i32, i32, i32
  }
  func.func @transform_16(%arg0: i32, %arg1: i32) -> (i32, i32, i32) {
    %c0_i32 = arith.constant 0 : i32
    %c0_i32_0 = arith.constant 0 : i32
    %c0_i32_1 = arith.constant 0 : i32
    return %arg1, %c0_i32, %c0_i32_0 : i32, i32, i32
  }
  func.func @transform_17(%arg0: i32, %arg1: i32) -> (i32, i32, i32) {
    %c0_i32 = arith.constant 0 : i32
    %c0_i32_0 = arith.constant 0 : i32
    %c0_i32_1 = arith.constant 0 : i32
    return %arg1, %c0_i32, %c0_i32_0 : i32, i32, i32
  }
  func.func @transform_18(%arg0: i32, %arg1: i32) -> (i32, i32, i32) {
    %c0_i32 = arith.constant 0 : i32
    %c0_i32_0 = arith.constant 0 : i32
    %c0_i32_1 = arith.constant 0 : i32
    return %arg1, %c0_i32, %c0_i32_0 : i32, i32, i32
  }
  func.func @transform_19(%arg0: i32, %arg1: i32) -> (i32, i32, i32) {
    %c0_i32 = arith.constant 0 : i32
    %c0_i32_0 = arith.constant 0 : i32
    %c0_i32_1 = arith.constant 0 : i32
    return %arg1, %c0_i32, %c0_i32_0 : i32, i32, i32
  }
  func.func @transform_20(%arg0: i32, %arg1: i32) -> (i32, i32, i32) {
    %c0_i32 = arith.constant 0 : i32
    %c0_i32_0 = arith.constant 0 : i32
    %c0_i32_1 = arith.constant 0 : i32
    return %arg1, %c0_i32, %c0_i32_0 : i32, i32, i32
  }
  func.func @transform_21(%arg0: i32, %arg1: i32) -> (i32, i32, i32) {
    %c0_i32 = arith.constant 0 : i32
    %c0_i32_0 = arith.constant 0 : i32
    %c0_i32_1 = arith.constant 0 : i32
    return %arg1, %c0_i32, %c0_i32_0 : i32, i32, i32
  }
  func.func @transform_22(%arg0: i32, %arg1: i32) -> (i32, i32, i32) {
    %c0_i32 = arith.constant 0 : i32
    %c0_i32_0 = arith.constant 0 : i32
    %c0_i32_1 = arith.constant 0 : i32
    return %arg1, %c0_i32, %c0_i32_0 : i32, i32, i32
  }
  func.func @transform_23(%arg0: i32, %arg1: i32) -> (i32, i32, i32) {
    %c0_i32 = arith.constant 0 : i32
    %c0_i32_0 = arith.constant 0 : i32
    %c0_i32_1 = arith.constant 0 : i32
    return %arg1, %c0_i32, %c0_i32_0 : i32, i32, i32
  }
  func.func @transform_24(%arg0: i32, %arg1: i32) -> (i32, i32, i32) {
    %c0_i32 = arith.constant 0 : i32
    %c0_i32_0 = arith.constant 0 : i32
    %c0_i32_1 = arith.constant 0 : i32
    return %arg1, %c0_i32, %c0_i32_0 : i32, i32, i32
  }
  func.func @transform_25(%arg0: i32, %arg1: i32) -> (i32, i32) {
    %c0_i32 = arith.constant 0 : i32
    %c0_i32_0 = arith.constant 0 : i32
    return %arg0, %c0_i32 : i32, i32
  }
}

</mosaic_0001>

<bundles_post_ra>
// kernel: clip_encode_image.1
= control target key start
LH: loop header
LB: loop body
LE: loop exit
PB: predicated region body
PF: predicated region fallthrough
CT: control target
= control target key end

     0   :  { %s3217_s29 = smov 0   ;;  %s3626_s0 = inlined_call_operand.vmem [shape: f32[16,192], index: 0, kind: input, shape index: {}]   ;;  %s3627_s1 = inlined_call_operand.vmem [shape: f32[8,32], index: 1, kind: input, shape index: {}]   ;;  %s3628_s2 = inlined_call_operand.vmem [shape: f32[16,16], index: 2, kind: input, shape index: {}]   ;;  %s3629_s3 = inlined_call_operand.vmem [shape: f32[1,32], index: 3, kind: input, shape index: {}]   ;;  %s3630_s4 = inlined_call_operand.vmem [shape: f32[1,32], index: 4, kind: input, shape index: {}]   ;;  %s3631_s5 = inlined_call_operand.vmem [shape: bf16[192,32], index: 5, kind: input, shape index: {}]   ;;  %s3632_s6 = inlined_call_operand.vmem [shape: f32[1,32], index: 6, kind: input, shape index: {}]   ;;  %s3633_s7 = inlined_call_operand.vmem [shape: f32[1,32], index: 7, kind: input, shape index: {}]   ;;  %s3634_s8 = inlined_call_operand.vmem [shape: bf16[32,16], index: 8, kind: input, shape index: {}]   ;;  %s3635_s9 = inlined_call_operand.vmem [shape: f32[2,1,32], index: 9, kind: input, shape index: {}]   ;;  %s3636_s10 = inlined_call_operand.vmem [shape: f32[2,1,32], index: 10, kind: input, shape index: {}]   ;;  %s3637_s11 = inlined_call_operand.vmem [shape: bf16[2,32,32], index: 11, kind: input, shape index: {}]   ;;  %s3638_s12 = inlined_call_operand.vmem [shape: bf16[2,32,32], index: 12, kind: input, shape index: {}]   ;;  %s3639_s13 = inlined_call_operand.vmem [shape: bf16[2,32,32], index: 13, kind: input, shape index: {}]   ;;  %s3640_s14 = inlined_call_operand.vmem [shape: f32[2,1,32], index: 14, kind: input, shape index: {}]   ;;  %s3641_s15 = inlined_call_operand.vmem [shape: f32[2,1,32], index: 15, kind: input, shape index: {}]   ;;  %s3642_s16 = inlined_call_operand.vmem [shape: f32[2,1,32], index: 16, kind: input, shape index: {}]   ;;  %s3643_s17 = inlined_call_operand.vmem [shape: bf16[2,32,32], index: 17, kind: input, shape index: {}]   ;;  %s3644_s18 = inlined_call_operand.vmem [shape: f32[2,1,32], index: 18, kind: input, shape index: {}]   ;;  %s3645_s19 = inlined_call_operand.vmem [shape: f32[2,1,32], index: 19, kind: input, shape index: {}]   ;;  %s3646_s20 = inlined_call_operand.vmem [shape: f32[2,1,32], index: 20, kind: input, shape index: {}]   ;;  %s3647_s21 = inlined_call_operand.vmem [shape: bf16[2,32,128], index: 21, kind: input, shape index: {}]   ;;  %s3648_s22 = inlined_call_operand.vmem [shape: f32[2,1,128], index: 22, kind: input, shape index: {}]   ;;  %s3649_s23 = inlined_call_operand.vmem [shape: bf16[2,128,32], index: 23, kind: input, shape index: {}]   ;;  %s3650_s24 = inlined_call_operand.vmem [shape: f32[2,1,32], index: 24, kind: input, shape index: {}]   ;;  %s3651_s25 = inlined_call_operand.vmem [shape: f32[16,16], index: 25, kind: output, shape index: {}]  }
   0x1   :  { %3660 = sst [smem:[#allocation7_spill]] %s3626_s0 }
   0x2   :  { %3661 = sst [smem:[#allocation8_spill]] %s3627_s1 }
   0x3   :  { %3662 = sst [smem:[#allocation9_spill]] %s3628_s2  ;;  %s3219_s2 = smov 0  }
   0x4   :  { %3663 = sst [smem:[#allocation10_spill]] %s3629_s3 }
   0x5   :  { %3664 = sst [smem:[#allocation11_spill]] %s3630_s4 }
   0x6   :  { %3665 = sst [smem:[#allocation12_spill]] %s3631_s5 }
   0x7   :  { %3666 = sst [smem:[#allocation13_spill]] %s3632_s6  ;;  %s3221_s6 = smov 0  }
   0x8   :  { %3667 = sst [smem:[#allocation14_spill]] %s3633_s7 }
   0x9   :  { %3668 = sst [smem:[#allocation15_spill]] %s3634_s8 }
   0xa   :  { %3669 = sst [smem:[#allocation16_spill]] %s3635_s9 }
   0xb   :  { %3670 = sst [smem:[#allocation17_spill]] %s3636_s10 }
   0xc   :  { %3671 = sst [smem:[#allocation18_spill]] %s3637_s11 }
   0xd   :  { %3672 = sst [smem:[#allocation19_spill]] %s3638_s12 }
   0xe   :  { %3673 = sst [smem:[#allocation20_spill]] %s3639_s13 }
   0xf   :  { %3674 = sst [smem:[#allocation21_spill]] %s3640_s14 }
  0x10   :  { %3675 = sst [smem:[#allocation22_spill]] %s3643_s17 }
  0x11   :  { %3676 = sst [smem:[#allocation23_spill]] %s3651_s25 }
  0x12 LB: > { %3677 = sst [smem:[#allocation3_spill]] %s3066_s29  ;;  %s44_s30 = sadd.s32 1, %s3070_s2  ;;  %s3074_s6 = sphi %s3221_s6, %s35_s6   ;;  %s3070_s2 = sphi %s3219_s2, %s3712_s2   ;;  %s3066_s29 = sphi %s3217_s29, %s3711_s29  }
  0x13   : > { %3678 = sst [smem:[#allocation4_spill]] %s3070_s2  ;;  %p2667_p0 = scmp.ge.s32.totalorder %s3074_s6, 1 }
  0x14   : > { %3679 = sst [smem:[#allocation5_spill]] %s3074_s6  ;;  %p45_p1 = scmp.ge.s32.totalorder %s44_s30, 2 }
  0x15   : > { %p841_p2 = scmp.lt.s32.totalorder %s3074_s6, 3 }
  0x16   : > { %s3714_s30 = smov (%p45_p1, %s44_s30), 0 }
  0x17   : > { %3680 = sst [smem:[#allocation6_spill]] %s3714_s30  ;;  %p842_p3 = pnand %p2667_p0, %p841_p2 }
  0x18   : > { %p977_p4 = scmp.lt.s32.totalorder (!%p842_p3), %s3066_s29, 1  ;;  %s3684_s11 = sld [smem:[#allocation18_spill]] (!%p842_p3) }
  0x19   : > { %845 = sbr.rel (%p842_p3) target bundleno = 3759 (0xeaf), region = 120  ;;  %s3685_s12 = sld [smem:[#allocation19_spill]] (!%p842_p3) }
  0x1a   : > { %s3686_s13 = sld [smem:[#allocation20_spill]] (!%p842_p3)  ;;  %s3687_s17 = sld [smem:[#allocation22_spill]] (!%p842_p3) }
  0x1b   : > { %s3688_s28 = sld [smem:[#allocation3_spill]] (!%p842_p3) }
  0x20   : > { %s3239_s7 = scalar_select %p977_p4, %s3066_s29, 1 }
  0x21   : > { %p2680_p5 = scmp.ne.s32.totalorder %s3688_s28, 0 }
  0x22   : > { %s2749_s9 = sshll.u32 %s3239_s7, 4  ;;  %s1020_s4 = scalar_lea.vmem %s3646_s20, %s3239_s7  ;;  %v3076_v1 = vmov (!%p2680_p5), 0   ;;  %vm1150_vm0 = vcmask (!%p2680_p5), 523264   ;;  %vm1198_vm1 = vcmask (!%p2680_p5), 261120  }
  0x23   : > { %s3257_s2 = scalar_lea.vmem %s3684_s11, %s2749_s9  ;;  %s3262_s29 = scalar_lea.vmem %s3685_s12, %s2749_s9  ;;  %1154 = vmatprep.subr.bf16.mxu0 (!%p2680_p5), %v3076_v1 }
  0x24   : > { %s3267_s27 = scalar_lea.vmem %s3686_s13, %s2749_s9  ;;  %s3280_s14 = scalar_lea.vmem %s3687_s17, %s2749_s9 }
  0x25   : > { %s1017_s13 = scalar_lea.vmem %s3645_s19, %s3239_s7  ;;  %s3297_s0 = scalar_lea.vmem %s3647_s21, %s2749_s9 }
  0x26   : > { %s1028_s30 = scalar_lea.vmem %s3648_s22, %s3239_s7  ;;  %s2754_s17 = sshll.u32 %s3239_s7, 6 }
  0x27   : > { %s3307_s12 = scalar_lea.vmem %s3649_s23, %s2754_s17  ;;  %1047 = sbr.rel (%p2680_p5) target bundleno = 626 (0x272), region = 124 }
  0x28   : > { %s3689_s3 = sld [smem:[#allocation12_spill]] (!%p2680_p5)  ;;  %s3690_s5 = sld [smem:[#allocation7_spill]] (!%p2680_p5) }
  0x29   : > { %s3691_s6 = sld [smem:[#allocation8_spill]] (!%p2680_p5)  ;;  %s3692_s1 = sld [smem:[#allocation10_spill]] (!%p2680_p5) }
  0x2a   : > { %s3693_s11 = sld [smem:[#allocation11_spill]] (!%p2680_p5) }
  0x2e   : > { %v2949_v0 = vld [vmem:[%s3689_s3] sm:$0xff]   ;;  %v2950_v2 = vld [vmem:[%s3689_s3 + $0x8] sm:$0xff]   ;;  %v2951_v3 = vld [vmem:[%s3689_s3 + $0x10] sm:$0xff]  }
  0x2f   : > { %1155 = vmatpush1.bf16.msra.mxu0 %v2949_v0  ;;  %v2952_v4 = vld [vmem:[%s3689_s3 + $0x18] sm:$0xff]   ;;  %v1049_v5 = vld [vmem:[%s3690_s5 + $0x8] sm:$0xff]  ;;  %v2953_v8 = vld [vmem:[%s3689_s3 + $0x20] sm:$0xff]  }
  0x30   : > { %1156 = vmatprep.subr.bf16.mxu0 %v3076_v1  ;;  %v1051_v6 = vld [vmem:[%s3690_s5 + $0x18] sm:$0xff]  ;;  %v2954_v9 = vld [vmem:[%s3689_s3 + $0x28] sm:$0xff]   ;;  %v2955_v10 = vld [vmem:[%s3689_s3 + $0x30] sm:$0xff]  }
  0x31   : > { %v1077_v7 = vpack.c.bf16 %v1051_v6, %v1049_v5  ;;  %v2956_v11 = vld [vmem:[%s3689_s3 + $0x38] sm:$0xff]   ;;  %v2957_v12 = vld [vmem:[%s3689_s3 + $0x40] sm:$0xff]   ;;  %v2958_v13 = vld [vmem:[%s3689_s3 + $0x48] sm:$0xff]  }
  0x32   : > { %v2959_v14 = vld [vmem:[%s3689_s3 + $0x50] sm:$0xff]   ;;  %v2960_v15 = vld [vmem:[%s3689_s3 + $0x58] sm:$0xff]   ;;  %v1048_v16 = vld [vmem:[%s3690_s5] sm:$0xff] }
  0x33   : > { %1157 = vmatpush1.bf16.msra.mxu0 %v2950_v2  ;;  %2693 = vmatprep.mubr.msk.bf16.mxu0 %vm1150_vm0, %v1077_v7  ;;  %v1050_v17 = vld [vmem:[%s3690_s5 + $0x10] sm:$0xff]  ;;  %v1195_v19 = vld [vmem:[%s3691_s6] sm:$0xff] }
  0x34   : > { %1158 = vmatprep.subr.bf16.mxu0 %v3076_v1  ;;  %v1076_v18 = vpack.c.bf16 %v1050_v17, %v1048_v16  ;;  %v2694_v45 = vld [vmem:[%s3692_s1] ss:$0 sm:$0xff] }
  0x35   : > { %v2695_v47 = vld [vmem:[%s3693_s11] ss:$0 sm:$0xff] }
  0x37   : > { %1159 = vmatpush1.bf16.msra.mxu0 %v2951_v3 }
  0x38   : > { %1160 = vmatprep.subr.bf16.mxu0 %v3076_v1 }
  0x3b   : > { %1161 = vmatpush1.bf16.msra.mxu0 %v2952_v4 }
  0x3c   : > { %1162 = vmatprep.subr.bf16.mxu0 %v3076_v1 }
  0x3f   : > { %1163 = vmatpush1.bf16.msra.mxu0 %v2953_v8 }
  0x40   : > { %1164 = vmatprep.subr.bf16.mxu0 %v3076_v1 }
  0x43   : > { %1165 = vmatpush1.bf16.msra.mxu0 %v2954_v9 }
  0x44   : > { %1166 = vmatprep.subr.bf16.mxu0 %v3076_v1 }
  0x47   : > { %1167 = vmatpush1.bf16.msra.mxu0 %v2955_v10 }
  0x48   : > { %1168 = vmatprep.subr.bf16.mxu0 %v3076_v1 }
  0x4b   : > { %1169 = vmatpush1.bf16.msra.mxu0 %v2956_v11 }
  0x4c   : > { %1170 = vmatprep.subr.bf16.mxu0 %v3076_v1 }
  0x4f   : > { %1171 = vmatpush1.bf16.msra.mxu0 %v2957_v12 }
  0x50   : > { %1172 = vmatprep.subr.bf16.mxu0 %v3076_v1 }
  0x53   : > { %1173 = vmatpush1.bf16.msra.mxu0 %v2958_v13 }
  0x54   : > { %1174 = vmatprep.subr.bf16.mxu0 %v3076_v1 }
  0x57   : > { %1175 = vmatpush1.bf16.msra.mxu0 %v2959_v14 }
  0x58   : > { %1176 = vmatprep.subr.bf16.mxu0 %v3076_v1 }
  0x5b   : > { %1177 = vmatpush1.bf16.msra.mxu0 %v2960_v15 }
  0x5e   : > { %1187 = vmatmul.mubr.bf16.vlgmr.msra.gmra.mrb[0].mxu0 %v1076_v18 }
 0x131   : > { %v1188_v20 = vpop.f32.mrb[0].mxu0 }
 0x132   : > { %v1196_v21 = vadd.f32 %v1195_v19, %v1188_v20  ;;  %v1190_v22 = vpop.f32.mrb[1].mxu0 }
 0x133   : > { %v1191_v23 = vpop.f32.mrb[2].mxu0 }
 0x134   : > { %v1197_v24 = vadd.f32 %v1195_v19, %v1191_v23  ;;  %v1193_v25 = vpop.f32.mrb[3].mxu0  ;;  %v1199_v26 = vsel %vm1198_vm1, %v1196_v21, 0.0 }
 0x135   : > { %1200 = vadd.xlane.f32.xlu0 %v1199_v26 }
 0x136   : > { %v1202_v27 = vsel %vm1198_vm1, %v1197_v24, 0.0 }
 0x139   : > { %1203 = vadd.xlane.f32.xlu0 %v1202_v27 }
 0x1c2   : > { %v1201_v28 = vpop.xlane.xlu0 %1200 }
 0x1c3   : > { %v1206_v29 = vmul.f32 0.03125, %v1201_v28 }
 0x1c5   : > { %v1208_v30 = vsub.f32 %v1196_v21, %v1206_v29 }
 0x1c6   : > { %v1204_v31 = vpop.xlane.xlu0 %1203 }
 0x1c7   : > { %v1207_v32 = vmul.f32 0.03125, %v1204_v31  ;;  %v1210_v33 = vmul.f32 %v1208_v30, %v1208_v30 }
 0x1c9   : > { %v1209_v34 = vsub.f32 %v1197_v24, %v1207_v32  ;;  %v1212_v35 = vsel %vm1198_vm1, %v1210_v33, 0.0 }
 0x1ca   : > { %1213 = vadd.xlane.f32.xlu1 %v1212_v35 }
 0x1cb   : > { %v1211_v36 = vmul.f32 %v1209_v34, %v1209_v34 }
 0x1cd   : > { %v1215_v37 = vsel %vm1198_vm1, %v1211_v36, 0.0 }
 0x1ce   : > { %1216 = vadd.xlane.f32.xlu1 %v1215_v37 }
 0x257   : > { %v1214_v38 = vpop.xlane.xlu1 %1213 }
 0x258   : > { %v1218_v39 = vmul.f32 0.03125, %v1214_v38 }
 0x25a   : > { %v1220_v40 = vadd.f32 1e-05, %v1218_v39 }
 0x25b   : > { %v1217_v41 = vpop.xlane.xlu1 %1216 }
 0x25c   : > { %2961 = vrsqrt.f32 %v1220_v40  ;;  %v1219_v42 = vmul.f32 0.03125, %v1217_v41 }
 0x25e   : > { %v1221_v43 = vadd.f32 1e-05, %v1219_v42 }
 0x260   : > { %2963 = vrsqrt.f32 %v1221_v43 }
 0x266   : > { %v2962_v44 = vpop.eup %2961 }
 0x267   : > { %v1224_v46 = vmul.f32 %v2962_v44, %v1208_v30 }
 0x269   : > { %v1233_v48 = vmul.f32 %v2694_v45, %v1224_v46 }
 0x26a   : > { %v2964_v49 = vpop.eup %2963 }
 0x26b   : > { %v1242_v50 = vadd.f32 %v2695_v47, %v1233_v48  ;;  %v1225_v51 = vmul.f32 %v2964_v49, %v1209_v34 }
 0x26d   : > { %1244 = vst.msk [vmem:[#allocation2] sm:$0xff] %vm1198_vm1, %v1242_v50  ;;  %v1234_v52 = vmul.f32 %v2694_v45, %v1225_v51 }
 0x26f   : > { %v1243_v53 = vadd.f32 %v2695_v47, %v1234_v52 }
 0x271   : > { %1245 = vst.msk [vmem:[#allocation2 + $0x8] sm:$0xff] %vm1198_vm1, %v1243_v53 }
 0x272 PF: > { %vm1248_vm2 = vcmask 261120   ;;  %v2980_v4 = vld [vmem:[%s3257_s2] sm:$0xff]   ;;  %v3077_v5 = vmov 0.0   ;;  %v2981_v6 = vld [vmem:[%s3257_s2 + $0x8] sm:$0xff]   ;;  %vm3078_vm3 = vmmov 0   ;;  %s3694_s17 = sld [smem:[#allocation16_spill]]  ;;  %s3700_s26 = scalar_lea.vmem %s3641_s15, %s3239_s7 }
 0x273   : > { %2798 = vmatprep.subr.bf16.mxu0 %v3077_v5  ;;  %2822 = vmatprep.subr.bf16.mxu1 %v3077_v5  ;;  %s3696_s8 = sld [smem:[#allocation17_spill]]  ;;  %v2982_v23 = vld [vmem:[%s3262_s29] sm:$0xff]   ;;  %v2983_v25 = vld [vmem:[%s3262_s29 + $0x8] sm:$0xff]   ;;  %s3698_s9 = sld [smem:[#allocation21_spill]]  ;;  %vm1497_vm4 = vcmask 64512   ;;  %vm1545_vm5 = vcmask 130048  }
 0x274   : > { %v3377_v54 = vld [vmem:[#allocation2] sm:$0xff]  ;;  %2799 = vmatpush3.bf16.msra.mxu0 %v2980_v4  ;;  %2802 = vmatprep.mubr.msk.bf16.mxu0 %vm3078_vm3, %v3077_v5  ;;  %v2985_v27 = vld [vmem:[%s3267_s27 + $0x8] sm:$0xff]   ;;  %s3082_s2 = smov 8   ;;  %vm2007_vm6 = vcmask 195584   ;;  %s3703_s6 = scalar_lea.vmem %s3644_s18, %s3239_s7 }
 0x275   : > { %v1249_v56 = vsel %vm1248_vm2, %v3377_v54, 0.0  ;;  %2800 = vmatprep.subr.bf16.mxu0 %v3077_v5  ;;  %2824 = vmatprep.mubr.msk.bf16.mxu1 %vm3078_vm3, %v3077_v5  ;;  %v2984_v26 = vld [vmem:[%s3267_s27] sm:$0xff]   ;;  %s3704_s29 = scalar_lea.vmem %s3650_s24, %s3239_s7  ;;  %s3705_s28 = sld [smem:[#allocation3_spill]] }
 0x276   : > { %1250 = vadd.xlane.f32.xlu0 %v1249_v56  ;;  %v2702_v38 = vld [vmem:[%s3700_s26] ss:$0 sm:$0xff]  ;;  %s3083_s26 = smov 16  }
 0x278   : > { %v3379_v55 = vld [vmem:[#allocation2 + $0x8] sm:$0xff]  ;;  %2801 = vmatpush3.bf16.msra.mxu0 %v2981_v6  ;;  %s3695_s25 = scalar_lea.vmem %s3694_s17, %s3239_s7  ;;  %s3079_s17 = smov 120  }
 0x279   : > { %v1252_v57 = vsel %vm1248_vm2, %v3379_v55, 0.0  ;;  %2806 = vmatprep.subr.bf16.mxu0 %v3077_v5  ;;  %v2696_v15 = vld [vmem:[%s3695_s25] ss:$0 sm:$0xff]  ;;  %s3697_s1 = scalar_lea.vmem %s3696_s8, %s3239_s7  ;;  %s3699_s11 = scalar_lea.vmem %s3698_s9, %s3239_s7 }
 0x27a   : > { %1253 = vadd.xlane.f32.xlu0 %v1252_v57  ;;  %v2697_v19 = vld [vmem:[%s3697_s1] ss:$0 sm:$0xff]  ;;  %s3080_s25 = smov 112   ;;  %s3701_s8 = scalar_lea.vmem %s3642_s16, %s3239_s7 }
 0x27b   : > { %v2698_v28 = vld [vmem:[%s3699_s11] ss:$0 sm:$0xff]  ;;  %s3081_s1 = smov 104   ;;  %s3702_s9 = sld [smem:[#allocation9_spill]] }
 0x27c   : > { %v2706_v47 = vld [vmem:[%s3701_s8] ss:$0 sm:$0xff]  ;;  %p2739_p6 = scmp.ne.s32.totalorder %s3705_s28, 1 }
 0x27d   : > { %s3706_s27 = sld [smem:[#allocation15_spill]] (!%p2739_p6)  ;;  %vm3086_vm7 = vmmov (!%p2739_p6), 0   ;;  %s3708_s8 = sld [smem:[#allocation14_spill]] (!%p2739_p6) }
 0x281   : > { %v1493_v4 = vld [vmem:[%s3702_s9 + $0x8] sm:$0xff] }
 0x303   : > { %v1251_v58 = vpop.xlane.xlu0 %1250 }
 0x304   : > { %v1256_v59 = vmul.f32 0.03125, %v1251_v58 }
 0x306   : > { %v1258_v60 = vsub.f32 %v3377_v54, %v1256_v59 }
 0x307   : > { %v1254_v61 = vpop.xlane.xlu0 %1253 }
 0x308   : > { %v1257_v62 = vmul.f32 0.03125, %v1254_v61  ;;  %v1260_v63 = vmul.f32 %v1258_v60, %v1258_v60 }
 0x30a   : > { %v1259_v0 = vsub.f32 %v3379_v55, %v1257_v62  ;;  %v1262_v1 = vsel %vm1248_vm2, %v1260_v63, 0.0 }
 0x30b   : > { %1263 = vadd.xlane.f32.xlu1 %v1262_v1 }
 0x30c   : > { %v1261_v2 = vmul.f32 %v1259_v0, %v1259_v0 }
 0x30e   : > { %v1265_v3 = vsel %vm1248_vm2, %v1261_v2, 0.0  ;;  %v1492_v2 = vld [vmem:[%s3702_s9] sm:$0xff] }
 0x30f   : > { %1266 = vadd.xlane.f32.xlu1 %v1265_v3 }
 0x398   : > { %v1264_v7 = vpop.xlane.xlu1 %1263 }
 0x399   : > { %v1268_v8 = vmul.f32 0.03125, %v1264_v7 }
 0x39b   : > { %v1270_v9 = vadd.f32 1e-05, %v1268_v8 }
 0x39c   : > { %v1267_v10 = vpop.xlane.xlu1 %1266 }
 0x39d   : > { %2998 = vrsqrt.f32 %v1270_v9  ;;  %v1269_v11 = vmul.f32 0.03125, %v1267_v10 }
 0x39f   : > { %v1271_v12 = vadd.f32 1e-05, %v1269_v11 }
 0x3a1   : > { %3000 = vrsqrt.f32 %v1271_v12 }
 0x3a7   : > { %v2999_v13 = vpop.eup %2998 }
 0x3a8   : > { %v1274_v14 = vmul.f32 %v2999_v13, %v1258_v60 }
 0x3aa   : > { %v1283_v18 = vmul.f32 %v2696_v15, %v1274_v14 }
 0x3ab   : > { %v3001_v16 = vpop.eup %3000 }
 0x3ac   : > { %v1275_v17 = vmul.f32 %v3001_v16, %v1259_v0  ;;  %v1292_v21 = vadd.f32 %v2697_v19, %v1283_v18 }
 0x3ae   : > { %v1284_v20 = vmul.f32 %v2696_v15, %v1275_v17 }
 0x3b0   : > { %v1293_v22 = vadd.f32 %v2697_v19, %v1284_v20 }
 0x3b2   : > { %v1298_v24 = vpack.c.bf16 %v1293_v22, %v1292_v21 }
 0x3b4   : > { %2803 = vmatmul.mubr.msk.bf16.vlgmr.msra.gmra.mrb[0].mxu0 %vm1248_vm2, %v1298_v24 }
 0x3b5   : > { %2807 = vmatpush3.bf16.msra.mxu0 %v2982_v23  ;;  %2810 = vmatprep.mubr.msk.bf16.mxu0 %vm3078_vm3, %v3077_v5 }
 0x3b6   : > { %2808 = vmatprep.subr.bf16.mxu0 %v3077_v5 }
 0x3b9   : > { %2809 = vmatpush3.bf16.msra.mxu0 %v2983_v25 }
 0x3ba   : > { %2814 = vmatprep.subr.bf16.mxu0 %v3077_v5 }
 0x3bc   : > { %2811 = vmatmul.mubr.msk.bf16.vlgmr.msra.gmra.mrb[4].mxu0 %vm1248_vm2, %v1298_v24 }
 0x3bd   : > { %2815 = vmatpush3.bf16.msra.mxu0 %v2984_v26  ;;  %2818 = vmatprep.mubr.msk.bf16.mxu0 %vm3078_vm3, %v3077_v5 }
 0x3be   : > { %2816 = vmatprep.subr.bf16.mxu0 %v3077_v5 }
 0x3c1   : > { %2817 = vmatpush3.bf16.msra.mxu0 %v2985_v27 }
 0x3c2   : > { %2828 = vmatprep.subr.bf16.mxu0 %v3077_v5 }
 0x3c4   : > { %2819 = vmatmul.mubr.msk.bf16.vlgmr.msra.gmra.mrb[8].mxu0 %vm1248_vm2, %v1298_v24 }
 0x3c5   : > { %2830 = vmatprep.mubr.msk.bf16.mxu0 %vm3078_vm3, %v3077_v5 }
 0x487   : > { %v1355_v29 = vpop.f32.mrb[0].mxu0 }
 0x488   : > { %v1356_v30 = vadd.f32 %v2698_v28, %v1355_v29  ;;  %v2804_v31 = vpop.f32.mrb[1].mxu0 }
 0x489   : > { %v1358_v32 = vpop.f32.mrb[2].mxu0 }
 0x48a   : > { %v1359_v33 = vadd.f32 %v2698_v28, %v1358_v32  ;;  %v2805_v34 = vpop.f32.mrb[3].mxu0  ;;  %v1362_v35 = vmul.f32 0.35355338, %v1356_v30 }
 0x48c   : > { %v1363_v36 = vmul.f32 0.35355338, %v1359_v33 }
 0x48e   : > { %v1494_v37 = vpack.c.bf16 %v1363_v36, %v1362_v35 }
 0x48f   : > { %v1421_v39 = vpop.f32.mrb[4].mxu0 }
 0x490   : > { %1614 = vrot.lane.b32.xlu1 %v1494_v37, %s3079_s17  ;;  %v2812_v40 = vpop.f32.mrb[5].mxu0  ;;  %v1422_v42 = vadd.f32 %v2702_v38, %v1421_v39 }
 0x491   : > { %v1424_v41 = vpop.f32.mrb[6].mxu0 }
 0x492   : > { %v1425_v43 = vadd.f32 %v2702_v38, %v1424_v41  ;;  %v2813_v44 = vpop.f32.mrb[7].mxu0 }
 0x494   : > { %v1495_v45 = vpack.c.bf16 %v1425_v43, %v1422_v42 }
 0x496   : > { %1739 = vrot.lane.b32.xlu1 %v1495_v45, %s3080_s25  ;;  %1617 = vrot.lane.b32.xlu0 %v1495_v45, %s3079_s17  ;;  %v1502_v46 = vsel %vm1497_vm4, %v1495_v45, 0 }
 0x497   : > { %v1485_v48 = vpop.f32.mrb[8].mxu0  ;;  %2823 = vmatpush3.bf16.xpose.msra.mxu1 %v1502_v46 }
 0x498   : > { %v2820_v49 = vpop.f32.mrb[9].mxu0  ;;  %2834 = vmatprep.subr.bf16.mxu1 %v3077_v5  ;;  %v1486_v51 = vadd.f32 %v2706_v47, %v1485_v48 }
 0x499   : > { %v1488_v50 = vpop.f32.mrb[10].mxu0 }
 0x49a   : > { %v1489_v52 = vadd.f32 %v2706_v47, %v1488_v50  ;;  %1737 = vrot.lane.b32.xlu1 %v1494_v37, %s3080_s25  ;;  %1860 = vrot.lane.b32.xlu0 %v1495_v45, %s3081_s1  ;;  %v2821_v53 = vpop.f32.mrb[11].mxu0 }
 0x49c   : > { %v3448_v56 = vpack.c.bf16 %v1489_v52, %v1486_v51 }
 0x49e   : > { %1858 = vrot.lane.b32.xlu1 %v1494_v37, %s3081_s1  ;;  %2825 = vmatmul.mubr.msk.bf16.vlgmr.msra.gmra.mrb[0].mxu1 %vm1497_vm4, %v1494_v37 }
 0x49f   : > { %2829 = vmatpush3.bf16.msra.mxu0 %v3448_v56  ;;  %2836 = vmatprep.mubr.msk.bf16.mxu1 %vm3078_vm3, %v3077_v5 }
 0x4a0   : > { %2840 = vmatprep.subr.bf16.mxu0 %v3077_v5 }
 0x502   : > { %v1615_v59 = vpop.permute.xlu1 %1614 }
 0x508   : > { %v1618_v57 = vpop.permute.xlu0 %1617  ;;  %v1740_v60 = vpop.permute.xlu1 %1739 }
 0x509   : > { %v1623_v58 = vsel %vm1497_vm4, %v1618_v57, 0  ;;  %v1745_v61 = vsel %vm1497_vm4, %v1740_v60, 0 }
 0x50a   : > { %2835 = vmatpush3.bf16.xpose.msra.mxu1 %v1623_v58 }
 0x50b   : > { %2846 = vmatprep.subr.bf16.mxu1 %v3077_v5 }
 0x50c   : > { %v1861_v62 = vpop.permute.xlu0 %1860  ;;  %v1738_v63 = vpop.permute.xlu1 %1737 }
 0x50d   : > { %v1866_v0 = vsel %vm1497_vm4, %v1861_v62, 0 }
 0x510   : > { %v1859_v1 = vpop.permute.xlu1 %1858 }
 0x511   : > { %2837 = vmatmul.mubr.msk.bf16.vlgmr.msra.gmra.mrb[4].mxu1 %vm1497_vm4, %v1615_v59 }
 0x512   : > { %2847 = vmatpush3.bf16.xpose.msra.mxu1 %v1745_v61  ;;  %2848 = vmatprep.mubr.msk.bf16.mxu1 %vm3078_vm3, %v3077_v5 }
 0x513   : > { %2858 = vmatprep.subr.bf16.mxu1 %v3077_v5 }
 0x519   : > { %2849 = vmatmul.mubr.msk.bf16.vlgmr.msra.gmra.mrb[8].mxu1 %vm1497_vm4, %v1738_v63 }
 0x51a   : > { %2859 = vmatpush3.bf16.xpose.msra.mxu1 %v1866_v0  ;;  %2860 = vmatprep.mubr.msk.bf16.mxu1 %vm3078_vm3, %v3077_v5 }
 0x51b   : > { %2870 = vmatprep.subr.bf16.mxu1 %v3077_v5 }
 0x521   : > { %2861 = vmatmul.mubr.msk.bf16.vlgmr.msra.gmra.mrb[12].mxu1 %vm1497_vm4, %v1859_v1 }
 0x522   : > { %2874 = vmatprep.mubr.msk.bf16.mxu1 %vm3078_vm3, %v3077_v5 }
 0x571   : > { %v1538_v3 = vpop.f32.mrb[0].mxu1 }
 0x572   : > { %v1539_v6 = vadd.f32 %v1538_v3, %v1492_v2  ;;  %v2826_v7 = vpop.f32.mrb[1].mxu1 }
 0x573   : > { %v1541_v8 = vpop.f32.mrb[2].mxu1 }
 0x574   : > { %v1542_v9 = vadd.f32 %v1541_v8, %v1493_v4  ;;  %v2827_v10 = vpop.f32.mrb[3].mxu1  ;;  %v1546_v11 = vsel %vm1545_vm5, %v1539_v6, -inf }
 0x575   : > { %1547 = vmax.xlane.f32.xlu0 %v1546_v11 }
 0x576   : > { %v1549_v12 = vsel %vm1545_vm5, %v1542_v9, -inf }
 0x577   : > { %1550 = vmax.xlane.f32.xlu1 %v1549_v12 }
 0x5e4   : > { %v1659_v13 = vpop.f32.mrb[4].mxu1 }
 0x5e5   : > { %v1660_v14 = vadd.f32 %v1659_v13, %v1492_v2  ;;  %v2838_v15 = vpop.f32.mrb[5].mxu1 }
 0x5e6   : > { %v1662_v16 = vpop.f32.mrb[6].mxu1 }
 0x5e7   : > { %v1663_v17 = vadd.f32 %v1662_v16, %v1493_v4  ;;  %v2839_v18 = vpop.f32.mrb[7].mxu1  ;;  %v1666_v19 = vsel %vm1545_vm5, %v1660_v14, -inf }
 0x5e8   : > { %1667 = vmax.xlane.f32.xlu0 %v1666_v19 }
 0x5e9   : > { %v1669_v20 = vsel %vm1545_vm5, %v1663_v17, -inf }
 0x5ec   : > { %1670 = vmax.xlane.f32.xlu0 %v1669_v20  ;;  %v1781_v21 = vpop.f32.mrb[8].mxu1 }
 0x5ed   : > { %v1782_v22 = vadd.f32 %v1781_v21, %v1492_v2  ;;  %v2850_v23 = vpop.f32.mrb[9].mxu1 }
 0x5ee   : > { %v1784_v24 = vpop.f32.mrb[10].mxu1 }
 0x5ef   : > { %v1785_v25 = vadd.f32 %v1784_v24, %v1493_v4  ;;  %v2851_v26 = vpop.f32.mrb[11].mxu1  ;;  %v1788_v27 = vsel %vm1545_vm5, %v1782_v22, -inf }
 0x5f0   : > { %1789 = vmax.xlane.f32.xlu0 %v1788_v27 }
 0x5f1   : > { %v1791_v28 = vsel %vm1545_vm5, %v1785_v25, -inf }
 0x5f2   : > { %1792 = vmax.xlane.f32.xlu1 %v1791_v28 }
 0x5f4   : > { %v1902_v29 = vpop.f32.mrb[12].mxu1 }
 0x5f5   : > { %v1903_v30 = vadd.f32 %v1902_v29, %v1492_v2  ;;  %v2862_v31 = vpop.f32.mrb[13].mxu1 }
 0x5f6   : > { %v1905_v32 = vpop.f32.mrb[14].mxu1 }
 0x5f7   : > { %v3483_v33 = vadd.f32 %v1905_v32, %v1493_v4  ;;  %v2863_v34 = vpop.f32.mrb[15].mxu1  ;;  %v1909_v35 = vsel %vm1545_vm5, %v1903_v30, -inf }
 0x5f8   : > { %1910 = vmax.xlane.f32.xlu0 %v1909_v35 }
 0x5f9   : > { %v1912_v36 = vsel %vm1545_vm5, %v3483_v33, -inf }
 0x5fa   : > { %1913 = vmax.xlane.f32.xlu1 %v1912_v36 }
 0x602   : > { %v1548_v37 = vpop.xlane.xlu0 %1547 }
 0x603   : > { %v1552_v38 = vsub.f32 %v1539_v6, %v1548_v37 }
 0x604   : > { %v1551_v39 = vpop.xlane.xlu1 %1550 }
 0x605   : > { %v1554_v40 = vmul.f32 1.442695, %v1552_v38  ;;  %v1553_v41 = vsub.f32 %v1542_v9, %v1551_v39 }
 0x607   : > { %3002 = vpow2.f32 %v1554_v40  ;;  %v1556_v42 = vmul.f32 1.442695, %v1553_v41 }
 0x609   : > { %3004 = vpow2.f32 %v1556_v42 }
 0x611   : > { %v3003_v43 = vpop.eup %3002 }
 0x612   : > { %v1558_v44 = vsel %vm1545_vm5, %v3003_v43, 0.0 }
 0x613   : > { %v3005_v45 = vpop.eup %3004  ;;  %1559 = vadd.xlane.f32.xlu0 %v1558_v44 }
 0x614   : > { %v1561_v46 = vsel %vm1545_vm5, %v3005_v45, 0.0 }
 0x615   : > { %1562 = vadd.xlane.f32.xlu1 %v1561_v46 }
 0x675   : > { %v1668_v47 = vpop.xlane.xlu0 %1667 }
 0x676   : > { %v1672_v48 = vsub.f32 %v1660_v14, %v1668_v47 }
 0x678   : > { %v1674_v49 = vmul.f32 1.442695, %v1672_v48 }
 0x679   : > { %v1671_v50 = vpop.xlane.xlu0 %1670 }
 0x67a   : > { %3006 = vpow2.f32 %v1674_v49  ;;  %v1673_v51 = vsub.f32 %v1663_v17, %v1671_v50 }
 0x67c   : > { %v1676_v52 = vmul.f32 1.442695, %v1673_v51 }
 0x67d   : > { %v1790_v53 = vpop.xlane.xlu0 %1789 }
 0x67e   : > { %3008 = vpow2.f32 %v1676_v52  ;;  %v1794_v57 = vsub.f32 %v1782_v22, %v1790_v53 }
 0x67f   : > { %v1793_v58 = vpop.xlane.xlu1 %1792 }
 0x680   : > { %v1796_v59 = vmul.f32 1.442695, %v1794_v57  ;;  %v1795_v60 = vsub.f32 %v1785_v25, %v1793_v58  ;;  %v2986_v57 = vld [vmem:[%s3280_s14] sm:$0xff]  }
 0x681   : > { %2871 = vmatpush3.bf16.msra.mxu1 %v2986_v57 }
 0x682   : > { %3010 = vpow2.f32 %v1796_v59  ;;  %v1798_v61 = vmul.f32 1.442695, %v1795_v60  ;;  %2872 = vmatprep.subr.bf16.mxu1 %v3077_v5 }
 0x684   : > { %v3007_v62 = vpop.eup %3006  ;;  %3012 = vpow2.f32 %v1798_v61 }
 0x685   : > { %v1911_v63 = vpop.xlane.xlu0 %1910  ;;  %v1678_v0 = vsel %vm1545_vm5, %v3007_v62, 0.0 }
 0x686   : > { %v1915_v1 = vsub.f32 %v1903_v30, %v1911_v63  ;;  %1679 = vadd.xlane.f32.xlu0 %v1678_v0 }
 0x687   : > { %v1914_v12 = vpop.xlane.xlu1 %1913 }
 0x688   : > { %v3009_v2 = vpop.eup %3008  ;;  %v1917_v3 = vmul.f32 1.442695, %v1915_v1  ;;  %v1916_v19 = vsub.f32 %v3483_v33, %v1914_v12  ;;  %v2987_v1 = vld [vmem:[%s3280_s14 + $0x8] sm:$0xff]  }
 0x689   : > { %v1681_v4 = vsel %vm1545_vm5, %v3009_v2, 0.0  ;;  %2873 = vmatpush3.bf16.msra.mxu1 %v2987_v1  ;;  %v2991_v1 = vld [vmem:[%s3307_s12 + $0x8] sm:$0xff]  }
 0x68a   : > { %3014 = vpow2.f32 %v1917_v3  ;;  %1682 = vadd.xlane.f32.xlu1 %v1681_v4  ;;  %v1919_v21 = vmul.f32 1.442695, %v1916_v19  ;;  %2886 = vmatprep.subr.bf16.mxu1 %v3077_v5 }
 0x68c   : > { %v3011_v6 = vpop.eup %3010 }
 0x68d   : > { %v1800_v7 = vsel %vm1545_vm5, %v3011_v6, 0.0 }
 0x68e   : > { %v3013_v8 = vpop.eup %3012  ;;  %1801 = vadd.xlane.f32.xlu0 %v1800_v7 }
 0x68f   : > { %v1803_v9 = vsel %vm1545_vm5, %v3013_v8, 0.0 }
 0x690   : > { %1804 = vadd.xlane.f32.xlu1 %v1803_v9 }
 0x694   : > { %v3015_v10 = vpop.eup %3014 }
 0x695   : > { %v1921_v11 = vsel %vm1545_vm5, %v3015_v10, 0.0 }
 0x696   : > { %1922 = vadd.xlane.f32.xlu0 %v1921_v11 }
 0x6a0   : > { %v1560_v13 = vpop.xlane.xlu0 %1559 }
 0x6a1   : > { %3016 = vrcp.f32 %v1560_v13  ;;  %1811 = vrot.lane.b32.xlu1 %v3448_v56, %s3080_s25  ;;  %s3707_s25 = sld [smem:[#allocation13_spill]] (!%p2739_p6) }
 0x6a2   : > { %v1563_v14 = vpop.xlane.xlu1 %1562 }
 0x6a3   : > { %3018 = vrcp.f32 %v1563_v14 }
 0x6a4   : > { %3020 = vpow2.f32 %v1919_v21 }
 0x6ab   : > { %v3017_v15 = vpop.eup %3016 }
 0x6ac   : > { %1690 = vrot.lane.b32.xlu0 %v3448_v56, %s3079_s17  ;;  %v1566_v17 = vmul.f32 %v3017_v15, %v3003_v43  ;;  %s3084_s17 = smov 24  }
 0x6ad   : > { %v3019_v16 = vpop.eup %3018 }
 0x6ae   : > { %v1567_v18 = vmul.f32 %v3019_v16, %v3005_v45  ;;  %v3021_v22 = vpop.eup %3020 }
 0x6af   : > { %v1924_v23 = vsel %vm1545_vm5, %v3021_v22, 0.0 }
 0x6b0   : > { %v1568_v20 = vpack.c.bf16 %v1567_v18, %v1566_v17 }
 0x6b2   : > { %2831 = vmatmul.mubr.msk.bf16.vlgmr.msra.gmra.mrb[12].mxu0 %vm1545_vm5, %v1568_v20 }
 0x6b3   : > { %2842 = vmatprep.mubr.msk.bf16.mxu0 %vm3078_vm3, %v3077_v5 }
 0x6c5   : > { %1925 = vadd.xlane.f32.xlu1 %v1924_v23 }
 0x6d6   : > { %1932 = vrot.lane.b32.xlu1 %v3448_v56, %s3081_s1 }
 0x713   : > { %v1680_v24 = vpop.xlane.xlu0 %1679 }
 0x717   : > { %v1683_v25 = vpop.xlane.xlu1 %1682 }
 0x718   : > { %3022 = vrcp.f32 %v1683_v25 }
 0x719   : > { %3024 = vrcp.f32 %v1680_v24  ;;  %v2718_v24 = vld [vmem:[%s3703_s6] ss:$0 sm:$0xff] }
 0x71b   : > { %v1802_v27 = vpop.xlane.xlu0 %1801 }
 0x71d   : > { %v1805_v26 = vpop.xlane.xlu1 %1804 }
 0x71e   : > { %3026 = vrcp.f32 %v1805_v26 }
 0x71f   : > { %3028 = vrcp.f32 %v1802_v27 }
 0x721   : > { %v1812_v56 = vpop.permute.xlu1 %1811 }
 0x722   : > { %v3023_v28 = vpop.eup %3022 }
 0x723   : > { %v1923_v29 = vpop.xlane.xlu0 %1922  ;;  %v3025_v30 = vpop.eup %3024  ;;  %v1687_v31 = vmul.f32 %v3023_v28, %v3009_v2 }
 0x724   : > { %v1686_v32 = vmul.f32 %v3025_v30, %v3007_v62  ;;  %3030 = vrcp.f32 %v1923_v29 }
 0x726   : > { %v1688_v34 = vpack.c.bf16 %v1687_v31, %v1686_v32 }
 0x727   : > { %v1691_v33 = vpop.permute.xlu0 %1690 }
 0x728   : > { %2841 = vmatpush3.bf16.msra.mxu0 %v1691_v33  ;;  %v3027_v35 = vpop.eup %3026 }
 0x729   : > { %2852 = vmatprep.subr.bf16.mxu0 %v3077_v5  ;;  %v3029_v36 = vpop.eup %3028  ;;  %v1809_v37 = vmul.f32 %v3027_v35, %v3013_v8 }
 0x72a   : > { %v1808_v38 = vmul.f32 %v3029_v36, %v3011_v6 }
 0x72b   : > { %2843 = vmatmul.mubr.msk.bf16.vlgmr.msra.gmra.mrb[16].mxu0 %vm1545_vm5, %v1688_v34 }
 0x72c   : > { %2853 = vmatpush3.bf16.msra.mxu0 %v1812_v56  ;;  %2854 = vmatprep.mubr.msk.bf16.mxu0 %vm3078_vm3, %v3077_v5  ;;  %v1810_v39 = vpack.c.bf16 %v1809_v37, %v1808_v38 }
 0x72d   : > { %2864 = vmatprep.subr.bf16.mxu0 %v3077_v5 }
 0x72e   : > { %v3031_v42 = vpop.eup %3030 }
 0x72f   : > { %v1929_v44 = vmul.f32 %v3031_v42, %v3015_v10  ;;  %v2988_v42 = vld [vmem:[%s3297_s0] sm:$0xff]  }
 0x733   : > { %2855 = vmatmul.mubr.msk.bf16.vlgmr.msra.gmra.mrb[20].mxu0 %vm1545_vm5, %v1810_v39 }
 0x734   : > { %2866 = vmatprep.mubr.msk.bf16.mxu0 %vm3078_vm3, %v3077_v5 }
 0x752   : > { %v1926_v40 = vpop.xlane.xlu1 %1925 }
 0x753   : > { %3032 = vrcp.f32 %v1926_v40 }
 0x756   : > { %v1933_v41 = vpop.permute.xlu1 %1932 }
 0x757   : > { %2865 = vmatpush3.bf16.msra.mxu0 %v1933_v41 }
 0x758   : > { %2878 = vmatprep.subr.bf16.mxu0 %v3077_v5 }
 0x75d   : > { %v3033_v43 = vpop.eup %3032 }
 0x75e   : > { %v1930_v45 = vmul.f32 %v3033_v43, %v3021_v22  ;;  %v2989_v43 = vld [vmem:[%s3297_s0 + $0x8] sm:$0xff]  }
 0x760   : > { %v1931_v46 = vpack.c.bf16 %v1930_v45, %v1929_v44 }
 0x762   : > { %2867 = vmatmul.mubr.msk.bf16.vlgmr.msra.gmra.mrb[24].mxu0 %vm1545_vm5, %v1931_v46 }
 0x763   : > { %2882 = vmatprep.mubr.msk.bf16.mxu0 %vm3078_vm3, %v3077_v5  ;;  %2879 = vmatpush3.bf16.msra.mxu0 %v2988_v42 }
 0x764   : > { %2880 = vmatprep.subr.bf16.mxu0 %v3077_v5 }
 0x767   : > { %2881 = vmatpush3.bf16.msra.mxu0 %v2989_v43 }
 0x785   : > { %v1606_v47 = vpop.f32.mrb[12].mxu0 }
 0x786   : > { %v2832_v48 = vpop.f32.mrb[13].mxu0 }
 0x787   : > { %v1609_v49 = vpop.f32.mrb[14].mxu0 }
 0x788   : > { %v2833_v50 = vpop.f32.mrb[15].mxu0 }
 0x7fe   : > { %v1730_v51 = vpop.f32.mrb[16].mxu0 }
 0x7ff   : > { %v2844_v52 = vpop.f32.mrb[17].mxu0 }
 0x800   : > { %v1733_v53 = vpop.f32.mrb[18].mxu0  ;;  %v2722_v52 = vld [vmem:[%s1017_s13] ss:$0 sm:$0xff]  ;;  %s3709_s13 = sld [smem:[#allocation23_spill]] (!%p2739_p6) }
 0x801   : > { %v2965_v58 = vpack.i.bf16 %v1733_v53, %v1730_v51  ;;  %v2845_v59 = vpop.f32.mrb[19].mxu0 }
 0x802   : > { %v2723_v59 = vld [vmem:[%s1020_s4] ss:$0 sm:$0xff] }
 0x803   : > { %2966 = vrot.lane.b32.xlu1 %v2965_v58, %s3082_s2 }
 0x806   : > { %v1851_v60 = vpop.f32.mrb[20].mxu0 }
 0x807   : > { %v2856_v61 = vpop.f32.mrb[21].mxu0 }
 0x808   : > { %v1854_v62 = vpop.f32.mrb[22].mxu0 }
 0x809   : > { %v2970_v63 = vpack.i.bf16 %v1854_v62, %v1851_v60  ;;  %v2857_v0 = vpop.f32.mrb[23].mxu0 }
 0x80a   : > { %v2990_v0 = vld [vmem:[%s3307_s12] sm:$0xff]  }
 0x80b   : > { %2971 = vrot.lane.b32.xlu0 %v2970_v63, %s3083_s26 }
 0x835   : > { %v1972_v2 = vpop.f32.mrb[24].mxu0 }
 0x836   : > { %v2868_v3 = vpop.f32.mrb[25].mxu0 }
 0x837   : > { %v1975_v4 = vpop.f32.mrb[26].mxu0  ;;  %v2993_v3 = vld [vmem:[%s3307_s12 + $0x18] sm:$0xff]  }
 0x838   : > { %v2975_v6 = vpack.i.bf16 %v1975_v4, %v1972_v2  ;;  %v2869_v7 = vpop.f32.mrb[27].mxu0  ;;  %v2992_v2 = vld [vmem:[%s3307_s12 + $0x10] sm:$0xff]   ;;  %v2994_v4 = vld [vmem:[%s3307_s12 + $0x20] sm:$0xff]  }
 0x839   : > { %v2996_v7 = vld [vmem:[%s3307_s12 + $0x30] sm:$0xff]  }
 0x83a   : > { %2976 = vrot.lane.b32.xlu1 %v2975_v6, %s3084_s17  ;;  %v2995_v6 = vld [vmem:[%s3307_s12 + $0x28] sm:$0xff]  }
 0x875   : > { %v2967_v8 = vpop.permute.xlu1 %2966 }
 0x876   : > { %v2969_v10 = vunpack.i.h.bf16 %v2967_v8  ;;  %v2968_v11 = vunpack.i.l.bf16 %v2967_v8  ;;  %v2997_v8 = vld [vmem:[%s3307_s12 + $0x38] sm:$0xff]  }
 0x878   : > { %v2004_v15 = vsel %vm1497_vm4, %v1609_v49, %v2969_v10  ;;  %v2003_v16 = vsel %vm1497_vm4, %v1606_v47, %v2968_v11 }
 0x87d   : > { %v2972_v9 = vpop.permute.xlu0 %2971 }
 0x87e   : > { %v2974_v12 = vunpack.i.h.bf16 %v2972_v9  ;;  %v2973_v13 = vunpack.i.l.bf16 %v2972_v9  ;;  %v2724_v9 = vld [vmem:[%s1028_s30] ss:$0 sm:$0xff] }
 0x880   : > { %v2006_v19 = vsel %vm1545_vm5, %v2004_v15, %v2974_v12  ;;  %v2005_v20 = vsel %vm1545_vm5, %v2003_v16, %v2973_v13 }
 0x8ac   : > { %v2977_v14 = vpop.permute.xlu1 %2976 }
 0x8ad   : > { %v2979_v17 = vunpack.i.h.bf16 %v2977_v14  ;;  %v2978_v18 = vunpack.i.l.bf16 %v2977_v14 }
 0x8af   : > { %v2009_v21 = vsel %vm2007_vm6, %v2006_v19, %v2979_v17  ;;  %v2008_v22 = vsel %vm2007_vm6, %v2005_v20, %v2978_v18 }
 0x8b0   : > { %v2014_v23 = vpack.c.bf16 %v2009_v21, %v2008_v22 }
 0x8b2   : > { %2875 = vmatmul.mubr.msk.bf16.vlgmr.msra.gmra.mrb[16].mxu1 %vm1248_vm2, %v2014_v23 }
 0x8b3   : > { %2902 = vmatprep.mubr.msk.bf16.mxu1 %vm3078_vm3, %v3077_v5  ;;  %2887 = vmatpush3.bf16.msra.mxu1 %v2990_v0  ;;  %v2741_v0 = vld [vmem:[%s3708_s8] ss:$0 sm:$0xff] (!%p2739_p6) }
 0x8b4   : > { %2888 = vmatprep.subr.bf16.mxu1 %v3077_v5 }
 0x8b7   : > { %2889 = vmatpush3.bf16.msra.mxu1 %v2991_v1 }
 0x8b8   : > { %2890 = vmatprep.subr.bf16.mxu1 %v3077_v5 }
 0x8bb   : > { %2891 = vmatpush3.bf16.msra.mxu1 %v2992_v2 }
 0x8bc   : > { %2892 = vmatprep.subr.bf16.mxu1 %v3077_v5 }
 0x8bf   : > { %2893 = vmatpush3.bf16.msra.mxu1 %v2993_v3 }
 0x8c0   : > { %2894 = vmatprep.subr.bf16.mxu1 %v3077_v5 }
 0x8c3   : > { %2895 = vmatpush3.bf16.msra.mxu1 %v2994_v4 }
 0x8c4   : > { %2896 = vmatprep.subr.bf16.mxu1 %v3077_v5 }
 0x8c7   : > { %2897 = vmatpush3.bf16.msra.mxu1 %v2995_v6 }
 0x8c8   : > { %2898 = vmatprep.subr.bf16.mxu1 %v3077_v5 }
 0x8cb   : > { %2899 = vmatpush3.bf16.msra.mxu1 %v2996_v7 }
 0x8cc   : > { %2900 = vmatprep.subr.bf16.mxu1 %v3077_v5 }
 0x8cf   : > { %2901 = vmatpush3.bf16.msra.mxu1 %v2997_v8 }
 0x985   : > { %v2071_v25 = vpop.f32.mrb[16].mxu1 }
 0x986   : > { %v2072_v26 = vadd.f32 %v2718_v24, %v2071_v25  ;;  %v2876_v27 = vpop.f32.mrb[17].mxu1 }
 0x987   : > { %v2074_v28 = vpop.f32.mrb[18].mxu1 }
 0x988   : > { %v3535_v29 = vadd.f32 %v2072_v26, %v3377_v54  ;;  %v2075_v30 = vadd.f32 %v2718_v24, %v2074_v28  ;;  %v2877_v31 = vpop.f32.mrb[19].mxu1  ;;  %v2730_v28 = vld [vmem:[%s3704_s29] ss:$0 sm:$0xff] }
 0x98a   : > { %v3538_v32 = vadd.f32 %v2075_v30, %v3379_v55  ;;  %v2080_v33 = vsel %vm1248_vm2, %v3535_v29, 0.0 }
 0x98b   : > { %2081 = vadd.xlane.f32.xlu0 %v2080_v33 }
 0x98c   : > { %v2083_v34 = vsel %vm1248_vm2, %v3538_v32, 0.0 }
 0x98d   : > { %2084 = vadd.xlane.f32.xlu1 %v2083_v34 }
 0xa18   : > { %v2082_v35 = vpop.xlane.xlu0 %2081 }
 0xa19   : > { %v2086_v56 = vmul.f32 0.03125, %v2082_v35 }
 0xa1a   : > { %v2085_v36 = vpop.xlane.xlu1 %2084 }
 0xa1b   : > { %v2088_v54 = vsub.f32 %v3535_v29, %v2086_v56  ;;  %v2087_v37 = vmul.f32 0.03125, %v2085_v36 }
 0xa1d   : > { %v2089_v38 = vsub.f32 %v3538_v32, %v2087_v37  ;;  %v2090_v55 = vmul.f32 %v2088_v54, %v2088_v54 }
 0xa1f   : > { %v2092_v39 = vsel %vm1248_vm2, %v2090_v55, 0.0  ;;  %v2091_v40 = vmul.f32 %v2089_v38, %v2089_v38 }
 0xa20   : > { %2093 = vadd.xlane.f32.xlu0 %v2092_v39 }
 0xa21   : > { %v2095_v41 = vsel %vm1248_vm2, %v2091_v40, 0.0 }
 0xa24   : > { %2096 = vadd.xlane.f32.xlu0 %v2095_v41 }
 0xaad   : > { %v2094_v44 = vpop.xlane.xlu0 %2093 }
 0xaae   : > { %v2098_v45 = vmul.f32 0.03125, %v2094_v44 }
 0xab0   : > { %v2100_v46 = vadd.f32 1e-05, %v2098_v45 }
 0xab1   : > { %v2097_v47 = vpop.xlane.xlu0 %2096 }
 0xab2   : > { %3034 = vrsqrt.f32 %v2100_v46  ;;  %v2099_v48 = vmul.f32 0.03125, %v2097_v47  ;;  %v3046_v46 = vld [vmem:[%s3706_s27] sm:$0xff] (!%p2739_p6)   ;;  %v3085_v47 = vmov (!%p2739_p6), 0.0  }
 0xab3   : > { %2906 = vmatprep.subr.bf16.mxu0 (!%p2739_p6), %v3085_v47 }
 0xab4   : > { %v2101_v49 = vadd.f32 1e-05, %v2099_v48  ;;  %v3047_v48 = vld [vmem:[%s3706_s27 + $0x8] sm:$0xff] (!%p2739_p6)  }
 0xab6   : > { %3036 = vrsqrt.f32 %v2101_v49 }
 0xabc   : > { %v3035_v50 = vpop.eup %3034 }
 0xabd   : > { %v2104_v51 = vmul.f32 %v3035_v50, %v2088_v54 }
 0xabf   : > { %v2113_v57 = vmul.f32 %v2722_v52, %v2104_v51 }
 0xac0   : > { %v3037_v53 = vpop.eup %3036 }
 0xac1   : > { %v2105_v58 = vmul.f32 %v3037_v53, %v2089_v38  ;;  %v2122_v61 = vadd.f32 %v2723_v59, %v2113_v57 }
 0xac3   : > { %v2114_v60 = vmul.f32 %v2722_v52, %v2105_v58 }
 0xac5   : > { %v2123_v62 = vadd.f32 %v2723_v59, %v2114_v60  ;;  %v2740_v60 = vld [vmem:[%s3707_s25] ss:$0 sm:$0xff] (!%p2739_p6) }
 0xac7   : > { %v2128_v63 = vpack.c.bf16 %v2123_v62, %v2122_v61 }
 0xac9   : > { %2883 = vmatmul.mubr.msk.bf16.vlgmr.msra.gmra.mrb[28].mxu0 %vm1248_vm2, %v2128_v63 }
 0xaca   : > { %2910 = vmatprep.mubr.msk.bf16.mxu0 (!%p2739_p6), %vm3086_vm7, %v3085_v47  ;;  %2907 = vmatpush3.bf16.msra.mxu0 (!%p2739_p6), %v3046_v46 }
 0xacb   : > { %2908 = vmatprep.subr.bf16.mxu0 (!%p2739_p6), %v3085_v47 }
 0xace   : > { %2909 = vmatpush3.bf16.msra.mxu0 (!%p2739_p6), %v3047_v48 }
 0xb9c   : > { %v2185_v10 = vpop.f32.mrb[28].mxu0 }
 0xb9d   : > { %v2186_v11 = vadd.f32 %v2724_v9, %v2185_v10  ;;  %v2884_v12 = vpop.f32.mrb[29].mxu0 }
 0xb9e   : > { %v2188_v13 = vpop.f32.mrb[30].mxu0 }
 0xb9f   : > { %v2728_v14 = vmul.f32 -1.702, %v2186_v11  ;;  %v2189_v15 = vadd.f32 %v2724_v9, %v2188_v13  ;;  %v2885_v16 = vpop.f32.mrb[31].mxu0 }
 0xba1   : > { %v2196_v17 = vmul.f32 1.442695, %v2728_v14  ;;  %v2729_v18 = vmul.f32 -1.702, %v2189_v15 }
 0xba3   : > { %3038 = vpow2.f32 %v2196_v17  ;;  %v2198_v19 = vmul.f32 1.442695, %v2729_v18 }
 0xba5   : > { %3040 = vpow2.f32 %v2198_v19 }
 0xbad   : > { %v3039_v5 = vpop.eup %3038 }
 0xbae   : > { %v2200_v20 = vadd.f32 1.0, %v3039_v5 }
 0xbaf   : > { %v3041_v21 = vpop.eup %3040 }
 0xbb0   : > { %3042 = vrcp.f32 %v2200_v20  ;;  %v2201_v22 = vadd.f32 1.0, %v3041_v21 }
 0xbb2   : > { %3044 = vrcp.f32 %v2201_v22 }
 0xbba   : > { %v3043_v23 = vpop.eup %3042 }
 0xbbb   : > { %v2206_v25 = vmul.f32 %v3043_v23, %v2186_v11 }
 0xbbc   : > { %v3045_v24 = vpop.eup %3044 }
 0xbbd   : > { %v2207_v26 = vmul.f32 %v3045_v24, %v2189_v15 }
 0xbbf   : > { %v2224_v27 = vpack.c.bf16 %v2207_v26, %v2206_v25 }
 0xbc1   : > { %2903 = vmatmul.mubr.bf16.vlgmr.msra.gmra.mrb[20].mxu1 %v2224_v27 }
 0xc94   : > { %v2314_v30 = vpop.f32.mrb[20].mxu1 }
 0xc95   : > { %v2315_v31 = vadd.f32 %v2730_v28, %v2314_v30  ;;  %v2904_v33 = vpop.f32.mrb[21].mxu1  ;;  %2328 = sbr.rel (%p2739_p6) target bundleno = 3759 (0xeaf), region = 128 }
 0xc96   : > { %v2317_v34 = vpop.f32.mrb[22].mxu1 }
 0xc97   : > { %v2321_v35 = vadd.f32 %v2315_v31, %v3535_v29  ;;  %v2318_v56 = vadd.f32 %v2730_v28, %v2317_v34  ;;  %v2905_v36 = vpop.f32.mrb[23].mxu1 }
 0xc99   : > { %2323 = vst.msk [vmem:[#allocation2] sm:$0xff] %vm1248_vm2, %v2321_v35  ;;  %v2322_v54 = vadd.f32 %v2318_v56, %v3538_v32  ;;  %v2329_v37 = vsel (!%p2739_p6), %vm1248_vm2, %v2321_v35, 0.0 }
 0xc9a   : > { %2330 = vadd.xlane.f32.xlu0 (!%p2739_p6), %v2329_v37 }
 0xc9b   : > { %2324 = vst.msk [vmem:[#allocation2 + $0x8] sm:$0xff] %vm1248_vm2, %v2322_v54  ;;  %v2332_v38 = vsel (!%p2739_p6), %vm1248_vm2, %v2322_v54, 0.0 }
 0xc9e   : > { %2333 = vadd.xlane.f32.xlu0 %v2332_v38 }
 0xd27   : > { %v2331_v55 = vpop.xlane.xlu0 %2330 }
 0xd28   : > { %v2335_v39 = vmul.f32 0.03125, %v2331_v55 }
 0xd2a   : > { %v2337_v29 = vsub.f32 %v2321_v35, %v2335_v39 }
 0xd2b   : > { %v2334_v40 = vpop.xlane.xlu0 %2333 }
 0xd2c   : > { %v2336_v41 = vmul.f32 0.03125, %v2334_v40  ;;  %v2339_v42 = vmul.f32 %v2337_v29, %v2337_v29 }
 0xd2e   : > { %v2338_v43 = vsub.f32 %v2322_v54, %v2336_v41  ;;  %v2341_v32 = vsel %vm1248_vm2, %v2339_v42, 0.0 }
 0xd2f   : > { %2342 = vadd.xlane.f32.xlu1 %v2341_v32 }
 0xd30   : > { %v2340_v44 = vmul.f32 %v2338_v43, %v2338_v43 }
 0xd32   : > { %v2344_v45 = vsel %vm1248_vm2, %v2340_v44, 0.0 }
 0xd33   : > { %2345 = vadd.xlane.f32.xlu1 %v2344_v45 }
 0xdbc   : > { %v2343_v49 = vpop.xlane.xlu1 %2342 }
 0xdbd   : > { %v2347_v50 = vmul.f32 0.03125, %v2343_v49 }
 0xdbf   : > { %v2349_v51 = vadd.f32 1e-05, %v2347_v50 }
 0xdc0   : > { %v2346_v52 = vpop.xlane.xlu1 %2345 }
 0xdc1   : > { %3048 = vrsqrt.f32 %v2349_v51  ;;  %v2348_v53 = vmul.f32 0.03125, %v2346_v52 }
 0xdc3   : > { %v2350_v57 = vadd.f32 1e-05, %v2348_v53 }
 0xdc5   : > { %3050 = vrsqrt.f32 %v2350_v57 }
 0xdcb   : > { %v3049_v58 = vpop.eup %3048 }
 0xdcc   : > { %v2353_v59 = vmul.f32 %v3049_v58, %v2337_v29 }
 0xdce   : > { %v2362_v63 = vmul.f32 %v2740_v60, %v2353_v59 }
 0xdcf   : > { %v3051_v61 = vpop.eup %3050 }
 0xdd0   : > { %v2354_v62 = vmul.f32 %v3051_v61, %v2338_v43  ;;  %v2371_v2 = vadd.f32 %v2741_v0, %v2362_v63 }
 0xdd2   : > { %v2363_v1 = vmul.f32 %v2740_v60, %v2354_v62 }
 0xdd4   : > { %v2372_v3 = vadd.f32 %v2741_v0, %v2363_v1 }
 0xdd6   : > { %v2377_v4 = vpack.c.bf16 %v2372_v3, %v2371_v2 }
 0xdd8   : > { %2911 = vmatmul.mubr.msk.bf16.vlgmr.msra.gmra.mrb[0].mxu0 %vm1248_vm2, %v2377_v4 }
 0xeab   : > { %v2427_v6 = vpop.f32.mrb[0].mxu0 }
 0xeac   : > { %2434 = vst.msk [vmem:[%s3709_s13] sm:$0xff] %vm1545_vm5, %v2427_v6  ;;  %v2912_v7 = vpop.f32.mrb[1].mxu0 }
 0xead   : > { %v2430_v8 = vpop.f32.mrb[2].mxu0 }
 0xeae   : > { %2435 = vst.msk [vmem:[%s3709_s13 + $0x8] sm:$0xff] %vm1545_vm5, %v2430_v8  ;;  %v2913_v9 = vpop.f32.mrb[3].mxu0 }
 0xeaf PF: > { %s3710_s30 = sld [smem:[#allocation5_spill]]  ;;  %s3711_s29 = sld [smem:[#allocation4_spill]] }
 0xeb0   : > { %s3712_s2 = sld [smem:[#allocation6_spill]] }
 0xeb5   : > { %s35_s6 = sadd.s32 1, %s3710_s30  }
 0xeb6   : > { %p32_p7 = scmp.ge.s32.totalorder %s35_s6, 4  }
 0xeb8   :  { %34 = sbr.rel (!%p32_p7) target bundleno = 18 (0x12), region = 206 }

</bundles_post_ra>
